<compile_context>
chip_gen: v7x
topology: tpu7x:2x2x1
jax: 0.10.0
libtpu: 0.0.40
codegen_flags: <defaults>
</compile_context>

<pallas_src>
import functools

import jax
import jax.numpy as jnp
from jax.experimental import pallas as pl
from jax.experimental.pallas import tpu as pltpu


def _round_up(v, m):
    return (v + m - 1) // m * m


# --------------------------------------------------------------------------
# Kernel 1: dense feature transform  XW = X @ W   (row-tiled, bf16 MXU).
# --------------------------------------------------------------------------
def xw_kernel(x_ref, w_ref, out_ref):
    out_ref[...] = jnp.dot(
        x_ref[...], w_ref[...], preferred_element_type=jnp.float32
    ).astype(out_ref.dtype)


def dense_transform(x, w, *, out_dtype, tm=256):
    n, f = x.shape
    h = w.shape[1]
    return pl.pallas_call(
        xw_kernel,
        out_shape=jax.ShapeDtypeStruct((n, h), out_dtype),
        grid_spec=pltpu.PrefetchScalarGridSpec(
            num_scalar_prefetch=0,
            grid=(n // tm,),
            in_specs=[
                pl.BlockSpec((tm, f), lambda i: (i, 0)),   # X row slab
                pl.BlockSpec((f, h), lambda i: (0, 0)),    # W (resident)
            ],
            out_specs=pl.BlockSpec((tm, h), lambda i: (i, 0)),
        ),
        compiler_params=pltpu.CompilerParams(
            dimension_semantics=("parallel",),
        ),
    )(x, w)


# --------------------------------------------------------------------------
# Kernel 2: neighborhood aggregation  act(A @ XW + b)   (rows parallel,
# contraction over A columns, f32 accumulation).
# --------------------------------------------------------------------------
def agg_kernel_scratch(a_ref, xw_ref, b_ref, out_ref, acc_ref, *, relu):
    """Layer with non-f32 output: accumulate in f32 scratch, cast in epilogue."""
    k = pl.program_id(1)

    @pl.when(k == 0)
    def _():
        acc_ref[...] = jnp.zeros_like(acc_ref)

    acc_ref[...] += jnp.dot(
        a_ref[...], xw_ref[...], preferred_element_type=jnp.float32
    )

    @pl.when(k == pl.num_programs(1) - 1)
    def _():
        z = acc_ref[...] + b_ref[...]
        if relu:
            z = jnp.maximum(z, 0.0)
        out_ref[...] = z.astype(out_ref.dtype)


def agg_kernel_inplace(a_ref, xw_ref, b_ref, out_ref):
    """f32 output, no activation: accumulate directly into the resident output."""
    k = pl.program_id(1)

    @pl.when(k == 0)
    def _():
        out_ref[...] = jnp.broadcast_to(b_ref[...], out_ref.shape)

    out_ref[...] += jnp.dot(
        a_ref[...], xw_ref[...], preferred_element_type=jnp.float32
    )


def agg_layer(a, xw, b, *, relu, out_dtype, tm, tk):
    n = a.shape[0]
    h = xw.shape[1]

    if out_dtype == jnp.float32 and not relu:
        kernel = agg_kernel_inplace
        scratch = []
    else:
        kernel = functools.partial(agg_kernel_scratch, relu=relu)
        scratch = [pltpu.VMEM((tm, h), jnp.float32)]

    return pl.pallas_call(
        kernel,
        out_shape=jax.ShapeDtypeStruct((n, h), out_dtype),
        grid_spec=pltpu.PrefetchScalarGridSpec(
            num_scalar_prefetch=0,
            grid=(n // tm, n // tk),
            in_specs=[
                pl.BlockSpec((tm, tk), lambda i, k: (i, k)),   # A_norm tile
                pl.BlockSpec((tk, h), lambda i, k: (k, 0)),    # XW rows for slab k
                pl.BlockSpec((1, h), lambda i, k: (0, 0)),     # bias (resident)
            ],
            out_specs=pl.BlockSpec((tm, h), lambda i, k: (i, 0)),
            scratch_shapes=scratch,
        ),
        compiler_params=pltpu.CompilerParams(
            dimension_semantics=("parallel", "arbitrary"),
        ),
    )(a, xw, b)


# --------------------------------------------------------------------------
# Wrappers
# --------------------------------------------------------------------------
def _pick_tiles(n_pad):
    """n_pad is a multiple of 512. Keep >= 2 row tiles for v7x megacore."""
    tk = min(512, n_pad)
    tm = 512 if (n_pad // 512) >= 2 else 256
    return tm, tk


def prepare_adjacency(a_norm, n_pad):
    """Pad + bf16-cast the normalized adjacency ONCE (graph is static per task)."""
    n = a_norm.shape[0]
    return (
        jnp.zeros((n_pad, n_pad), jnp.bfloat16)
        .at[:n, :n]
        .set(a_norm.astype(jnp.bfloat16))
    )


def net_forward(a_p, x, w1, b1, w2, b2, *, n_nodes):
    """Pallas-backed NET.forward: 2-layer GCN on a pre-padded bf16 adjacency."""
    n_pad = a_p.shape[0]
    tm, tk = _pick_tiles(n_pad)

    f = x.shape[1]
    hd = w1.shape[1]
    c = w2.shape[1]
    f_pad = _round_up(f, 128)
    h_pad = _round_up(hd, 128)
    c_pad = _round_up(c, 128)

    bf16 = jnp.bfloat16
    x_p = jnp.zeros((n_pad, f_pad), bf16).at[:n_nodes, :f].set(x.astype(bf16))
    w1_p = jnp.zeros((f_pad, h_pad), bf16).at[:f, :hd].set(w1.astype(bf16))
    b1_p = jnp.zeros((1, h_pad), jnp.float32).at[:, :hd].set(b1.astype(jnp.float32))
    w2_p = jnp.zeros((h_pad, c_pad), bf16).at[:hd, :c].set(w2.astype(bf16))
    b2_p = jnp.zeros((1, c_pad), jnp.float32).at[:, :c].set(b2.astype(jnp.float32))

    # Layer 1: dense transform once, then aggregate. Padded rows of h1 become
    # ReLU(b1) != 0 -- harmless only because padded A columns are zero.
    xw1 = dense_transform(x_p, w1_p, out_dtype=bf16)
    h1 = agg_layer(a_p, xw1, b1_p, relu=True, out_dtype=bf16, tm=tm, tk=tk)

    # Layer 2: f32 logits, accumulate directly into the output block.
    xw2 = dense_transform(h1, w2_p, out_dtype=bf16)
    out = agg_layer(a_p, xw2, b2_p, relu=False, out_dtype=jnp.float32, tm=tm, tk=tk)
    return out[:n_nodes, :c]


def build_normalized_adjacency(n):
    """Ring graph + self loops, symmetric normalization (plain-JAX glue)."""
    idx = jnp.arange(n)
    a = jnp.zeros((n, n), jnp.float32)
    a = a.at[idx, (idx + 1) % n].set(1.0)
    a = a.at[(idx + 1) % n, idx].set(1.0)
    a = a + jnp.eye(n, dtype=jnp.float32)
    deg = jnp.sum(a, axis=1)
    d_inv_sqrt = 1.0 / jnp.sqrt(deg)
    return a * d_inv_sqrt[:, None] * d_inv_sqrt[None, :]


if __name__ == "__main__":
    # Small, module-consistent shapes: N nodes, F input feats, Hd hidden, C classes.
    N, F, Hd, C = 512, 128, 128, 16

    key = jax.random.PRNGKey(0)
    k_x, k_w1, k_b1, k_w2, k_b2 = jax.random.split(key, 5)

    x = jax.random.normal(k_x, (N, F), dtype=jnp.float32)
    w1 = jax.random.normal(k_w1, (F, Hd), dtype=jnp.float32) * (1.0 / jnp.sqrt(F))
    b1 = jax.random.normal(k_b1, (1, Hd), dtype=jnp.float32) * 0.01
    w2 = jax.random.normal(k_w2, (Hd, C), dtype=jnp.float32) * (1.0 / jnp.sqrt(Hd))
    b2 = jax.random.normal(k_b2, (1, C), dtype=jnp.float32) * 0.01

    a_norm = build_normalized_adjacency(N)

    # Pad + cast the adjacency once (static graph) -- NOT per forward call.
    N_PAD = _round_up(N, 512)
    a_p = jax.block_until_ready(prepare_adjacency(a_norm, N_PAD))
    # Padded columns of A must be exactly zero (padded H1 rows are non-zero).
    assert bool(jnp.all(a_p[:, N:] == 0)) and bool(jnp.all(a_p[N:, :] == 0))

    fwd = jax.jit(
        lambda ap, xx, wa, ba, wb, bb: net_forward(ap, xx, wa, ba, wb, bb, n_nodes=N)
    )
    out = fwd(a_p, x, w1, b1, w2, b2)
    out = jax.block_until_ready(out)
    assert out.shape == (N, C)

    # Reference 1: pure-JAX with the SAME bf16 operands / f32 accumulation path.
    bf16 = jnp.bfloat16
    ab, xb = a_norm.astype(bf16), x.astype(bf16)
    w1b, w2b = w1.astype(bf16), w2.astype(bf16)
    xw1_ref = jnp.dot(xb, w1b, preferred_element_type=jnp.float32).astype(bf16)
    h1_ref = jnp.maximum(
        jnp.dot(ab, xw1_ref, preferred_element_type=jnp.float32) + b1, 0.0
    ).astype(bf16)
    xw2_ref = jnp.dot(h1_ref, w2b, preferred_element_type=jnp.float32).astype(bf16)
    out_bf16_ref = jnp.dot(ab, xw2_ref, preferred_element_type=jnp.float32) + b2
    assert jnp.allclose(out, out_bf16_ref, atol=1e-2, rtol=1e-2), float(
        jnp.max(jnp.abs(out - out_bf16_ref))
    )

    # Reference 2: full f32 baseline (quantifies bf16 precision loss, looser tol).
    h1_f32 = jnp.maximum(a_norm @ (x @ w1) + b1, 0.0)
    out_f32_ref = a_norm @ (h1_f32 @ w2) + b2
    assert jnp.allclose(out, out_f32_ref, atol=1e-1, rtol=1e-1), float(
        jnp.max(jnp.abs(out - out_f32_ref))
    )

    print("KERNEL_OK")
</pallas_src>

<mosaic_0001>
module attributes {stable_mosaic.version = 11 : i64} {
  func.func @xw_kernel(%arg0: i32, %arg1: memref<256x128xbf16, #tpu.memory_space<vmem>>, %arg2: memref<128x128xbf16, #tpu.memory_space<vmem>>, %arg3: memref<256x128xbf16, #tpu.memory_space<vmem>>) attributes {dimension_semantics = [#tpu.dimension_semantics<parallel>], iteration_bounds = array<i64: 2>, scalar_prefetch = 0 : i64, scratch_operands = 0 : i64, tpu.core_type = #tpu.core_type<tc>, window_params = [{transform_indices = @transform_0, window_bounds = array<i64: 256, 128>}, {pipeline_mode = #tpu.pipeline_mode<synchronous>, transform_indices = @transform_1, window_bounds = array<i64: 128, 128>}, {transform_indices = @transform_2, window_bounds = array<i64: 256, 128>}]} {
    %c0 = arith.constant 0 : index
    %c0_0 = arith.constant 0 : index
    %0 = vector.load %arg1[%c0, %c0_0] : memref<256x128xbf16, #tpu.memory_space<vmem>>, vector<256x128xbf16>
    %c0_1 = arith.constant 0 : index
    %c0_2 = arith.constant 0 : index
    %1 = vector.load %arg2[%c0_1, %c0_2] : memref<128x128xbf16, #tpu.memory_space<vmem>>, vector<128x128xbf16>
    %cst = arith.constant dense<0.000000e+00> : vector<256x128xf32>
    %2 = tpu.matmul %0, %1, %cst {dimension_numbers = #tpu.dot_dimension_numbers<[1], [0], [0], [1], [0, 0, 1, 1], [], []>} : vector<256x128xbf16>, vector<128x128xbf16>, vector<256x128xf32> -> vector<256x128xf32>
    %3 = arith.truncf %2 : vector<256x128xf32> to vector<256x128xbf16>
    %c0_3 = arith.constant 0 : index
    %c0_4 = arith.constant 0 : index
    %4 = vector.load %arg3[%c0_3, %c0_4] : memref<256x128xbf16, #tpu.memory_space<vmem>>, vector<256x128xbf16>
    tpu.vector_store %arg3[%c0_3, %c0_4], %3 {strides = array<i32>} : memref<256x128xbf16, #tpu.memory_space<vmem>>, vector<256x128xbf16>,
    return
  }
  func.func @transform_0(%arg0: i32) -> (i32, i32) {
    %c0_i32 = arith.constant 0 : i32
    %c0_i32_0 = arith.constant 0 : i32
    return %arg0, %c0_i32 : i32, i32
  }
  func.func @transform_1(%arg0: i32) -> (i32, i32) {
    %c0_i32 = arith.constant 0 : i32
    %c0_i32_0 = arith.constant 0 : i32
    %c0_i32_1 = arith.constant 0 : i32
    return %c0_i32, %c0_i32_0 : i32, i32
  }
  func.func @transform_2(%arg0: i32) -> (i32, i32) {
    %c0_i32 = arith.constant 0 : i32
    %c0_i32_0 = arith.constant 0 : i32
    return %arg0, %c0_i32 : i32, i32
  }
}

module attributes {stable_mosaic.version = 11 : i64} {
  func.func @agg_kernel_scratch(%arg0: i32, %arg1: i32, %arg2: memref<256x512xbf16, #tpu.memory_space<vmem>>, %arg3: memref<512x128xbf16, #tpu.memory_space<vmem>>, %arg4: memref<1x128xf32, #tpu.memory_space<vmem>>, %arg5: memref<256x128xbf16, #tpu.memory_space<vmem>>, %arg6: memref<256x128xf32, #tpu.memory_space<vmem>>) attributes {dimension_semantics = [#tpu.dimension_semantics<parallel>, #tpu.dimension_semantics<arbitrary>], iteration_bounds = array<i64: 2, 1>, scalar_prefetch = 0 : i64, scratch_operands = 1 : i64, tpu.core_type = #tpu.core_type<tc>, window_params = [{transform_indices = @transform_0, window_bounds = array<i64: 256, 512>}, {transform_indices = @transform_1, window_bounds = array<i64: 512, 128>}, {pipeline_mode = #tpu.pipeline_mode<synchronous>, transform_indices = @transform_2, window_bounds = array<i64: 1, 128>}, {transform_indices = @transform_3, window_bounds = array<i64: 256, 128>}]} {
    %c0_i32 = arith.constant 0 : i32
    %0 = arith.cmpi eq, %arg1, %c0_i32 : i32
    %1 = arith.extui %0 : i1 to i32
    %c0_i32_0 = arith.constant 0 : i32
    %2 = arith.cmpi ne, %1, %c0_i32_0 : i32
    scf.if %2 {
      %cst_10 = arith.constant 0.000000e+00 : f32
      %12 = vector.broadcast %cst_10 : f32 to vector<256x128xf32>
      %c0_11 = arith.constant 0 : index
      %c0_12 = arith.constant 0 : index
      %13 = vector.load %arg6[%c0_11, %c0_12] : memref<256x128xf32, #tpu.memory_space<vmem>>, vector<256x128xf32>
      tpu.vector_store %arg6[%c0_11, %c0_12], %12 {strides = array<i32>} : memref<256x128xf32, #tpu.memory_space<vmem>>, vector<256x128xf32>,
    } else {
    }
    %c0 = arith.constant 0 : index
    %c0_1 = arith.constant 0 : index
    %3 = vector.load %arg6[%c0, %c0_1] : memref<256x128xf32, #tpu.memory_space<vmem>>, vector<256x128xf32>
    %c0_2 = arith.constant 0 : index
    %c0_3 = arith.constant 0 : index
    %4 = vector.load %arg2[%c0_2, %c0_3] : memref<256x512xbf16, #tpu.memory_space<vmem>>, vector<256x512xbf16>
    %c0_4 = arith.constant 0 : index
    %c0_5 = arith.constant 0 : index
    %5 = vector.load %arg3[%c0_4, %c0_5] : memref<512x128xbf16, #tpu.memory_space<vmem>>, vector<512x128xbf16>
    %cst = arith.constant dense<0.000000e+00> : vector<256x128xf32>
    %6 = tpu.matmul %4, %5, %cst {dimension_numbers = #tpu.dot_dimension_numbers<[1], [0], [0], [1], [0, 0, 1, 1], [], []>} : vector<256x512xbf16>, vector<512x128xbf16>, vector<256x128xf32> -> vector<256x128xf32>
    %7 = arith.addf %3, %6 : vector<256x128xf32>
    %c0_6 = arith.constant 0 : index
    %c0_7 = arith.constant 0 : index
    %8 = vector.load %arg6[%c0_6, %c0_7] : memref<256x128xf32, #tpu.memory_space<vmem>>, vector<256x128xf32>
    tpu.vector_store %arg6[%c0_6, %c0_7], %7 {strides = array<i32>} : memref<256x128xf32, #tpu.memory_space<vmem>>, vector<256x128xf32>,
    %c0_i32_8 = arith.constant 0 : i32
    %9 = arith.cmpi eq, %arg1, %c0_i32_8 : i32
    %10 = arith.extui %9 : i1 to i32
    %c0_i32_9 = arith.constant 0 : i32
    %11 = arith.cmpi ne, %10, %c0_i32_9 : i32
    scf.if %11 {
      %c0_10 = arith.constant 0 : index
      %c0_11 = arith.constant 0 : index
      %12 = vector.load %arg6[%c0_10, %c0_11] : memref<256x128xf32, #tpu.memory_space<vmem>>, vector<256x128xf32>
      %c0_12 = arith.constant 0 : index
      %c0_13 = arith.constant 0 : index
      %13 = vector.load %arg4[%c0_12, %c0_13] : memref<1x128xf32, #tpu.memory_space<vmem>>, vector<1x128xf32>
      %14 = vector.broadcast %13 : vector<1x128xf32> to vector<256x128xf32>
      %15 = arith.addf %12, %14 : vector<256x128xf32>
      %cst_14 = arith.constant 0.000000e+00 : f32
      %16 = vector.broadcast %cst_14 : f32 to vector<256x128xf32>
      %17 = arith.maximumf %15, %16 : vector<256x128xf32>
      %18 = arith.truncf %17 : vector<256x128xf32> to vector<256x128xbf16>
      %c0_15 = arith.constant 0 : index
      %c0_16 = arith.constant 0 : index
      %19 = vector.load %arg5[%c0_15, %c0_16] : memref<256x128xbf16, #tpu.memory_space<vmem>>, vector<256x128xbf16>
      tpu.vector_store %arg5[%c0_15, %c0_16], %18 {strides = array<i32>} : memref<256x128xbf16, #tpu.memory_space<vmem>>, vector<256x128xbf16>,
    } else {
    }
    return
  }
  func.func @transform_0(%arg0: i32, %arg1: i32) -> (i32, i32) {
    %c0_i32 = arith.constant 0 : i32
    return %arg0, %arg1 : i32, i32
  }
  func.func @transform_1(%arg0: i32, %arg1: i32) -> (i32, i32) {
    %c0_i32 = arith.constant 0 : i32
    %c0_i32_0 = arith.constant 0 : i32
    return %arg1, %c0_i32 : i32, i32
  }
  func.func @transform_2(%arg0: i32, %arg1: i32) -> (i32, i32) {
    %c0_i32 = arith.constant 0 : i32
    %c0_i32_0 = arith.constant 0 : i32
    %c0_i32_1 = arith.constant 0 : i32
    return %c0_i32, %c0_i32_0 : i32, i32
  }
  func.func @transform_3(%arg0: i32, %arg1: i32) -> (i32, i32) {
    %c0_i32 = arith.constant 0 : i32
    %c0_i32_0 = arith.constant 0 : i32
    return %arg0, %c0_i32 : i32, i32
  }
}

module attributes {stable_mosaic.version = 11 : i64} {
  func.func @agg_kernel_inplace(%arg0: i32, %arg1: i32, %arg2: memref<256x512xbf16, #tpu.memory_space<vmem>>, %arg3: memref<512x128xbf16, #tpu.memory_space<vmem>>, %arg4: memref<1x128xf32, #tpu.memory_space<vmem>>, %arg5: memref<256x128xf32, #tpu.memory_space<vmem>>) attributes {dimension_semantics = [#tpu.dimension_semantics<parallel>, #tpu.dimension_semantics<arbitrary>], iteration_bounds = array<i64: 2, 1>, scalar_prefetch = 0 : i64, scratch_operands = 0 : i64, tpu.core_type = #tpu.core_type<tc>, window_params = [{transform_indices = @transform_0, window_bounds = array<i64: 256, 512>}, {transform_indices = @transform_1, window_bounds = array<i64: 512, 128>}, {pipeline_mode = #tpu.pipeline_mode<synchronous>, transform_indices = @transform_2, window_bounds = array<i64: 1, 128>}, {transform_indices = @transform_3, window_bounds = array<i64: 256, 128>}]} {
    %c0_i32 = arith.constant 0 : i32
    %0 = arith.cmpi eq, %arg1, %c0_i32 : i32
    %1 = arith.extui %0 : i1 to i32
    %c0_i32_0 = arith.constant 0 : i32
    %2 = arith.cmpi ne, %1, %c0_i32_0 : i32
    scf.if %2 {
      %c0_8 = arith.constant 0 : index
      %c0_9 = arith.constant 0 : index
      %9 = vector.load %arg4[%c0_8, %c0_9] : memref<1x128xf32, #tpu.memory_space<vmem>>, vector<1x128xf32>
      %10 = vector.shape_cast %9 : vector<1x128xf32> to vector<1x128xf32>
      %11 = vector.broadcast %10 : vector<1x128xf32> to vector<256x128xf32>
      %c0_10 = arith.constant 0 : index
      %c0_11 = arith.constant 0 : index
      %12 = vector.load %arg5[%c0_10, %c0_11] : memref<256x128xf32, #tpu.memory_space<vmem>>, vector<256x128xf32>
      tpu.vector_store %arg5[%c0_10, %c0_11], %11 {strides = array<i32>} : memref<256x128xf32, #tpu.memory_space<vmem>>, vector<256x128xf32>,
    } else {
    }
    %c0 = arith.constant 0 : index
    %c0_1 = arith.constant 0 : index
    %3 = vector.load %arg5[%c0, %c0_1] : memref<256x128xf32, #tpu.memory_space<vmem>>, vector<256x128xf32>
    %c0_2 = arith.constant 0 : index
    %c0_3 = arith.constant 0 : index
    %4 = vector.load %arg2[%c0_2, %c0_3] : memref<256x512xbf16, #tpu.memory_space<vmem>>, vector<256x512xbf16>
    %c0_4 = arith.constant 0 : index
    %c0_5 = arith.constant 0 : index
    %5 = vector.load %arg3[%c0_4, %c0_5] : memref<512x128xbf16, #tpu.memory_space<vmem>>, vector<512x128xbf16>
    %cst = arith.constant dense<0.000000e+00> : vector<256x128xf32>
    %6 = tpu.matmul %4, %5, %cst {dimension_numbers = #tpu.dot_dimension_numbers<[1], [0], [0], [1], [0, 0, 1, 1], [], []>} : vector<256x512xbf16>, vector<512x128xbf16>, vector<256x128xf32> -> vector<256x128xf32>
    %7 = arith.addf %3, %6 : vector<256x128xf32>
    %c0_6 = arith.constant 0 : index
    %c0_7 = arith.constant 0 : index
    %8 = vector.load %arg5[%c0_6, %c0_7] : memref<256x128xf32, #tpu.memory_space<vmem>>, vector<256x128xf32>
    tpu.vector_store %arg5[%c0_6, %c0_7], %7 {strides = array<i32>} : memref<256x128xf32, #tpu.memory_space<vmem>>, vector<256x128xf32>,
    return
  }
  func.func @transform_0(%arg0: i32, %arg1: i32) -> (i32, i32) {
    %c0_i32 = arith.constant 0 : i32
    return %arg0, %arg1 : i32, i32
  }
  func.func @transform_1(%arg0: i32, %arg1: i32) -> (i32, i32) {
    %c0_i32 = arith.constant 0 : i32
    %c0_i32_0 = arith.constant 0 : i32
    return %arg1, %c0_i32 : i32, i32
  }
  func.func @transform_2(%arg0: i32, %arg1: i32) -> (i32, i32) {
    %c0_i32 = arith.constant 0 : i32
    %c0_i32_0 = arith.constant 0 : i32
    %c0_i32_1 = arith.constant 0 : i32
    return %c0_i32, %c0_i32_0 : i32, i32
  }
  func.func @transform_3(%arg0: i32, %arg1: i32) -> (i32, i32) {
    %c0_i32 = arith.constant 0 : i32
    %c0_i32_0 = arith.constant 0 : i32
    return %arg0, %c0_i32 : i32, i32
  }
}

</mosaic_0001>

<bundles_post_ra>
// kernel: _lambda_.4
= control target key start
LH: loop header
LB: loop body
LE: loop exit
PB: predicated region body
PF: predicated region fallthrough
CT: control target
= control target key end

     0   :  { %s1054_s9 = smov 0   ;;  %s1138_s0 = inlined_call_operand.vmem [shape: bf16[512,128], index: 0, kind: input, shape index: {}]   ;;  %s1139_s1 = inlined_call_operand.vmem [shape: bf16[128,128], index: 1, kind: input, shape index: {}]   ;;  %s1140_s2 = inlined_call_operand.vmem [shape: bf16[512,128], index: 2, kind: output, shape index: {}]  }
   0x1 LB: > { %s717_s10 = sadd.s32 4294967295, %s1037_s9   ;;  %p721_p0 = scmp.ge.s32.totalorder %s1037_s9, 1  ;;  %s1037_s9 = sphi %s1054_s9, %s12_s9  }
   0x2   : > { %p113_p1 = scmp.lt.s32.totalorder %s1037_s9, 3 }
   0x4   : > { %p114_p2 = pnand %p721_p0, %p113_p1 }
   0x5   : > { %v1007_v0 = vld [vmem:[%s1139_s1] sm:$0xff] (!%p114_p2)   ;;  %s722_s13 = sshll.u32 (!%p114_p2), %s717_s10, 5  ;;  %v1008_v1 = vld [vmem:[%s1139_s1 + $0x8] sm:$0xff] (!%p114_p2)   ;;  %v1009_v2 = vld [vmem:[%s1139_s1 + $0x10] sm:$0xff] (!%p114_p2)  }
   0x6   : > { %117 = sbr.rel (%p114_p2) target bundleno = 280 (0x118), region = 28  ;;  %p136_p3 = scmp.lt.s32.totalorder (!%p114_p2), %s722_s13, 63  ;;  %935 = vmatprep.subr.bf16.mxu0 (!%p114_p2), %v1007_v0  ;;  %983 = vmatprep.subr.bf16.mxu1 (!%p114_p2), %v1007_v0  ;;  %v1010_v3 = vld [vmem:[%s1139_s1 + $0x18] sm:$0xff] (!%p114_p2)   ;;  %v1011_v6 = vld [vmem:[%s1139_s1 + $0x20] sm:$0xff] (!%p114_p2)   ;;  %v1012_v7 = vld [vmem:[%s1139_s1 + $0x28] sm:$0xff] (!%p114_p2)  }
   0x7   : > { %936 = vmatpush3.bf16.msra.mxu0 (!%p114_p2), %v1007_v0  ;;  %991 = vmatpush3.bf16.msra.mxu1 (!%p114_p2), %v1007_v0  ;;  %v1013_v8 = vld [vmem:[%s1139_s1 + $0x30] sm:$0xff] (!%p114_p2)   ;;  %v1014_v9 = vld [vmem:[%s1139_s1 + $0x38] sm:$0xff] (!%p114_p2)  }
   0x8   : > { %937 = vmatprep.subr.bf16.mxu0 (!%p114_p2), %v1008_v1  ;;  %984 = vmatprep.subr.bf16.mxu1 (!%p114_p2), %v1008_v1 }
   0xb   : > { %938 = vmatpush3.bf16.msra.mxu0 (!%p114_p2), %v1008_v1  ;;  %992 = vmatpush3.bf16.msra.mxu1 (!%p114_p2), %v1008_v1 }
   0xc   : > { %939 = vmatprep.subr.bf16.mxu0 (!%p114_p2), %v1009_v2  ;;  %985 = vmatprep.subr.bf16.mxu1 (!%p114_p2), %v1009_v2 }
   0xd   : > { %s1142_s13 = smov (!%p136_p3, %s722_s13), 63 }
   0xe   : > { %s723_s18 = sshll.u32 %s1142_s13, 2 }
   0xf   : > { %s1079_s21 = scalar_lea.vmem %s1138_s0, %s723_s18  ;;  %940 = vmatpush3.bf16.msra.mxu0 %v1009_v2  ;;  %993 = vmatpush3.bf16.msra.mxu1 %v1009_v2  ;;  %s1117_s6 = scalar_lea.vmem %s1140_s2, %s723_s18 }
  0x10   : > { %v1015_v4 = vld [vmem:[%s1079_s21] sm:$0xff]   ;;  %941 = vmatprep.subr.bf16.mxu0 %v1010_v3  ;;  %986 = vmatprep.subr.bf16.mxu1 %v1010_v3  ;;  %v1017_v10 = vld [vmem:[%s1079_s21 + $0x8] sm:$0xff]   ;;  %v1019_v12 = vld [vmem:[%s1079_s21 + $0x10] sm:$0xff]  }
  0x11   : > { %v1016_v5 = vld [vmem:[%s1079_s21 + $0x40] sm:$0xff]   ;;  %951 = vmatprep.mubr.bf16.mxu0 %v1015_v4  ;;  %v1018_v11 = vld [vmem:[%s1079_s21 + $0x48] sm:$0xff]   ;;  %v1020_v13 = vld [vmem:[%s1079_s21 + $0x50] sm:$0xff]  }
  0x12   : > { %967 = vmatprep.mubr.bf16.mxu1 %v1016_v5  ;;  %v1021_v14 = vld [vmem:[%s1079_s21 + $0x18] sm:$0xff]   ;;  %v1023_v16 = vld [vmem:[%s1079_s21 + $0x20] sm:$0xff]   ;;  %v1025_v18 = vld [vmem:[%s1079_s21 + $0x28] sm:$0xff]  }
  0x13   : > { %942 = vmatpush3.bf16.msra.mxu0 %v1010_v3  ;;  %994 = vmatpush3.bf16.msra.mxu1 %v1010_v3  ;;  %v1022_v15 = vld [vmem:[%s1079_s21 + $0x58] sm:$0xff]   ;;  %v1024_v17 = vld [vmem:[%s1079_s21 + $0x60] sm:$0xff]   ;;  %v1026_v19 = vld [vmem:[%s1079_s21 + $0x68] sm:$0xff]  }
  0x14   : > { %943 = vmatprep.subr.bf16.mxu0 %v1011_v6  ;;  %987 = vmatprep.subr.bf16.mxu1 %v1011_v6  ;;  %v1027_v20 = vld [vmem:[%s1079_s21 + $0x30] sm:$0xff]   ;;  %v1029_v22 = vld [vmem:[%s1079_s21 + $0x38] sm:$0xff]  }
  0x15   : > { %v1028_v21 = vld [vmem:[%s1079_s21 + $0x70] sm:$0xff]   ;;  %v1030_v23 = vld [vmem:[%s1079_s21 + $0x78] sm:$0xff]  }
  0x17   : > { %944 = vmatpush3.bf16.msra.mxu0 %v1011_v6  ;;  %995 = vmatpush3.bf16.msra.mxu1 %v1011_v6 }
  0x18   : > { %945 = vmatprep.subr.bf16.mxu0 %v1012_v7  ;;  %988 = vmatprep.subr.bf16.mxu1 %v1012_v7 }
  0x1b   : > { %946 = vmatpush3.bf16.msra.mxu0 %v1012_v7  ;;  %996 = vmatpush3.bf16.msra.mxu1 %v1012_v7 }
  0x1c   : > { %947 = vmatprep.subr.bf16.mxu0 %v1013_v8  ;;  %989 = vmatprep.subr.bf16.mxu1 %v1013_v8 }
  0x1f   : > { %948 = vmatpush3.bf16.msra.mxu0 %v1013_v8  ;;  %997 = vmatpush3.bf16.msra.mxu1 %v1013_v8 }
  0x20   : > { %949 = vmatprep.subr.bf16.mxu0 %v1014_v9  ;;  %990 = vmatprep.subr.bf16.mxu1 %v1014_v9 }
  0x23   : > { %950 = vmatpush3.bf16.msra.mxu0 %v1014_v9  ;;  %998 = vmatpush3.bf16.msra.mxu1 %v1014_v9 }
  0x26   : > { %952 = vmatmul.mubr.bf16.vlgmr.msra.gmra.mrb[0].mxu0 %v1017_v10  ;;  %968 = vmatmul.mubr.bf16.vlgmr.msra.gmra.mrb[0].mxu1 %v1018_v11 }
  0x27   : > { %955 = vmatprep.mubr.bf16.mxu0 %v1019_v12  ;;  %971 = vmatprep.mubr.bf16.mxu1 %v1020_v13 }
  0x2e   : > { %956 = vmatmul.mubr.bf16.gmra.mrb[4].mxu0 %v1021_v14  ;;  %972 = vmatmul.mubr.bf16.gmra.mrb[4].mxu1 %v1022_v15 }
  0x2f   : > { %959 = vmatprep.mubr.bf16.mxu0 %v1023_v16  ;;  %975 = vmatprep.mubr.bf16.mxu1 %v1024_v17 }
  0x36   : > { %960 = vmatmul.mubr.bf16.gmra.mrb[8].mxu0 %v1025_v18  ;;  %976 = vmatmul.mubr.bf16.gmra.mrb[8].mxu1 %v1026_v19 }
  0x37   : > { %963 = vmatprep.mubr.bf16.mxu0 %v1027_v20  ;;  %979 = vmatprep.mubr.bf16.mxu1 %v1028_v21 }
  0x3e   : > { %964 = vmatmul.mubr.bf16.gmra.mrb[12].mxu0 %v1029_v22  ;;  %980 = vmatmul.mubr.bf16.gmra.mrb[12].mxu1 %v1030_v23 }
  0xf9   : > { %v953_v24 = vpop.f32.mrb[0].mxu0  ;;  %v969_v25 = vpop.f32.mrb[0].mxu1 }
  0xfa   : > { %v374_v26 = vpop.f32.mrb[1].mxu0  ;;  %v438_v27 = vpop.f32.mrb[1].mxu1 }
  0xfb   : > { %v954_v28 = vpop.f32.mrb[2].mxu0  ;;  %v970_v29 = vpop.f32.mrb[2].mxu1 }
  0xfc   : > { %v824_v30 = vpack.c.bf16 %v954_v28, %v953_v24  ;;  %v864_v31 = vpack.c.bf16 %v970_v29, %v969_v25  ;;  %v377_v32 = vpop.f32.mrb[3].mxu0  ;;  %v441_v33 = vpop.f32.mrb[3].mxu1 }
  0xfd   : > { %v819_v34 = vpack.c.bf16 %v377_v32, %v374_v26  ;;  %v859_v35 = vpack.c.bf16 %v441_v33, %v438_v27 }
  0xfe   : > { %896 = vst [vmem:[%s1117_s6 + $0x8] sm:$0xff] %v824_v30   ;;  %904 = vst [vmem:[%s1117_s6 + $0x48] sm:$0xff] %v864_v31  }
  0xff   : > { %820 = vst [vmem:[%s1117_s6] sm:$0xff] %v819_v34   ;;  %903 = vst [vmem:[%s1117_s6 + $0x40] sm:$0xff] %v859_v35  }
 0x101   : > { %v957_v36 = vpop.f32.mrb[4].mxu0  ;;  %v973_v37 = vpop.f32.mrb[4].mxu1 }
 0x102   : > { %v390_v38 = vpop.f32.mrb[5].mxu0  ;;  %v454_v39 = vpop.f32.mrb[5].mxu1 }
 0x103   : > { %v958_v40 = vpop.f32.mrb[6].mxu0  ;;  %v974_v41 = vpop.f32.mrb[6].mxu1 }
 0x104   : > { %v834_v42 = vpack.c.bf16 %v958_v40, %v957_v36  ;;  %v874_v43 = vpack.c.bf16 %v974_v41, %v973_v37  ;;  %v393_v44 = vpop.f32.mrb[7].mxu0  ;;  %v457_v45 = vpop.f32.mrb[7].mxu1 }
 0x105   : > { %v829_v46 = vpack.c.bf16 %v393_v44, %v390_v38  ;;  %v869_v47 = vpack.c.bf16 %v457_v45, %v454_v39 }
 0x106   : > { %898 = vst [vmem:[%s1117_s6 + $0x18] sm:$0xff] %v834_v42   ;;  %906 = vst [vmem:[%s1117_s6 + $0x58] sm:$0xff] %v874_v43  }
 0x107   : > { %897 = vst [vmem:[%s1117_s6 + $0x10] sm:$0xff] %v829_v46   ;;  %905 = vst [vmem:[%s1117_s6 + $0x50] sm:$0xff] %v869_v47  }
 0x109   : > { %v961_v48 = vpop.f32.mrb[8].mxu0  ;;  %v977_v49 = vpop.f32.mrb[8].mxu1 }
 0x10a   : > { %v406_v50 = vpop.f32.mrb[9].mxu0  ;;  %v470_v51 = vpop.f32.mrb[9].mxu1 }
 0x10b   : > { %v962_v52 = vpop.f32.mrb[10].mxu0  ;;  %v978_v53 = vpop.f32.mrb[10].mxu1 }
 0x10c   : > { %v844_v54 = vpack.c.bf16 %v962_v52, %v961_v48  ;;  %v884_v55 = vpack.c.bf16 %v978_v53, %v977_v49  ;;  %v409_v56 = vpop.f32.mrb[11].mxu0  ;;  %v473_v57 = vpop.f32.mrb[11].mxu1 }
 0x10d   : > { %v839_v58 = vpack.c.bf16 %v409_v56, %v406_v50  ;;  %v879_v59 = vpack.c.bf16 %v473_v57, %v470_v51 }
 0x10e   : > { %900 = vst [vmem:[%s1117_s6 + $0x28] sm:$0xff] %v844_v54   ;;  %908 = vst [vmem:[%s1117_s6 + $0x68] sm:$0xff] %v884_v55  }
 0x10f   : > { %899 = vst [vmem:[%s1117_s6 + $0x20] sm:$0xff] %v839_v58   ;;  %907 = vst [vmem:[%s1117_s6 + $0x60] sm:$0xff] %v879_v59  }
 0x111   : > { %v965_v60 = vpop.f32.mrb[12].mxu0  ;;  %v981_v61 = vpop.f32.mrb[12].mxu1 }
 0x112   : > { %v422_v62 = vpop.f32.mrb[13].mxu0  ;;  %v486_v63 = vpop.f32.mrb[13].mxu1 }
 0x113   : > { %v966_v0 = vpop.f32.mrb[14].mxu0  ;;  %v982_v1 = vpop.f32.mrb[14].mxu1 }
 0x114   : > { %v854_v2 = vpack.c.bf16 %v966_v0, %v965_v60  ;;  %v894_v3 = vpack.c.bf16 %v982_v1, %v981_v61  ;;  %v425_v4 = vpop.f32.mrb[15].mxu0  ;;  %v489_v5 = vpop.f32.mrb[15].mxu1 }
 0x115   : > { %v849_v6 = vpack.c.bf16 %v425_v4, %v422_v62  ;;  %v889_v7 = vpack.c.bf16 %v489_v5, %v486_v63 }
 0x116   : > { %902 = vst [vmem:[%s1117_s6 + $0x38] sm:$0xff] %v854_v2   ;;  %910 = vst [vmem:[%s1117_s6 + $0x78] sm:$0xff] %v894_v3  }
 0x117   : > { %901 = vst [vmem:[%s1117_s6 + $0x30] sm:$0xff] %v849_v6   ;;  %909 = vst [vmem:[%s1117_s6 + $0x70] sm:$0xff] %v889_v7  }
 0x118 PF: > { %s12_s9 = sadd.s32 1, %s1037_s9  }
 0x119   : > { %p9_p4 = scmp.ge.s32.totalorder %s12_s9, 4  }
 0x11b   :  { %11 = sbr.rel (!%p9_p4) target bundleno = 1 (0x1), region = 58 }

// kernel: _lambda_.7
= control target key start
LH: loop header
LB: loop body
LE: loop exit
PB: predicated region body
PF: predicated region fallthrough
CT: control target
= control target key end

     0   :  { %s1946_s12 = smov 0   ;;  %s1948_s13 = smov 0   ;;  %s2219_s0 = inlined_call_operand.vmem [shape: bf16[512,512], index: 0, kind: input, shape index: {}]   ;;  %s2220_s1 = inlined_call_operand.vmem [shape: bf16[512,128], index: 1, kind: input, shape index: {}]   ;;  %s2221_s2 = inlined_call_operand.vmem [shape: f32[1,128], index: 2, kind: input, shape index: {}]   ;;  %s2222_s3 = inlined_call_operand.vmem [shape: f32[512,128], index: 3, kind: output, shape index: {}]  }
   0x1   :  { %s1950_s14 = smov 0  }
   0x2 LB: > { %s25_s15 = sadd.s32 1, %s1920_s13  ;;  %p1420_p0 = scmp.ge.s32.totalorder %s1924_s14, 1  ;;  %s1924_s14 = sphi %s1950_s14, %s13_s14   ;;  %s1920_s13 = sphi %s1948_s13, %s2224_s13   ;;  %s1916_s12 = sphi %s1946_s12, %s2223_s12  }
   0x3   : > { %p27_p1 = scmp.ge.s32.totalorder %s25_s15, 2  ;;  %p169_p2 = scmp.lt.s32.totalorder %s1924_s14, 3 }
   0x5   : > { %s2226_s15 = smov (%p27_p1, %s25_s15), 0  ;;  %p170_p3 = pnand %p1420_p0, %p169_p2 }
   0x6   : > { %v1774_v0 = vld [vmem:[%s2220_s1 + $0x40] sm:$0xff] (!%p170_p3)   ;;  %v1778_v4 = vld [vmem:[%s2220_s1 + $0x48] sm:$0xff] (!%p170_p3)   ;;  %v1782_v8 = vld [vmem:[%s2220_s1 + $0x50] sm:$0xff] (!%p170_p3)   ;;  %s1421_s25 = sshll.u32 (!%p170_p3), %s1916_s12, 5 }
   0x7   : > { %173 = sbr.rel (%p170_p3) target bundleno = 383 (0x17f), region = 32  ;;  %v1775_v1 = vld [vmem:[%s2220_s1 + $0xc0] sm:$0xff] (!%p170_p3)   ;;  %1526 = vmatprep.subr.bf16.mxu0 (!%p170_p3), %v1774_v0  ;;  %v1779_v5 = vld [vmem:[%s2220_s1 + $0xc8] sm:$0xff] (!%p170_p3)   ;;  %v1783_v9 = vld [vmem:[%s2220_s1 + $0xd0] sm:$0xff] (!%p170_p3)   ;;  %p205_p4 = scmp.lt.s32.totalorder (!%p170_p3), %s1421_s25, 63 }
   0x8   : > { %v1776_v2 = vld [vmem:[%s2220_s1] sm:$0xff] (!%p170_p3)   ;;  %1638 = vmatprep.subr.bf16.mxu1 (!%p170_p3), %v1775_v1  ;;  %v1780_v6 = vld [vmem:[%s2220_s1 + $0x8] sm:$0xff] (!%p170_p3)   ;;  %v1784_v10 = vld [vmem:[%s2220_s1 + $0x10] sm:$0xff] (!%p170_p3)  }
   0x9   : > { %v1777_v3 = vld [vmem:[%s2220_s1 + $0x80] sm:$0xff] (!%p170_p3)   ;;  %1527 = vmatpush3.bf16.msra.mxu0 (!%p170_p3), %v1776_v2  ;;  %v1781_v7 = vld [vmem:[%s2220_s1 + $0x88] sm:$0xff] (!%p170_p3)   ;;  %v1785_v11 = vld [vmem:[%s2220_s1 + $0x90] sm:$0xff] (!%p170_p3)  }
   0xa   : > { %1639 = vmatpush3.bf16.msra.mxu1 (!%p170_p3), %v1777_v3  ;;  %1528 = vmatprep.subr.bf16.mxu0 (!%p170_p3), %v1778_v4  ;;  %v1786_v12 = vld [vmem:[%s2220_s1 + $0x58] sm:$0xff] (!%p170_p3)   ;;  %v1790_v16 = vld [vmem:[%s2220_s1 + $0x60] sm:$0xff] (!%p170_p3)   ;;  %v1794_v20 = vld [vmem:[%s2220_s1 + $0x68] sm:$0xff] (!%p170_p3)  }
   0xb   : > { %1640 = vmatprep.subr.bf16.mxu1 (!%p170_p3), %v1779_v5  ;;  %v1787_v13 = vld [vmem:[%s2220_s1 + $0xd8] sm:$0xff] (!%p170_p3)   ;;  %v1791_v17 = vld [vmem:[%s2220_s1 + $0xe0] sm:$0xff] (!%p170_p3)   ;;  %v1795_v21 = vld [vmem:[%s2220_s1 + $0xe8] sm:$0xff] (!%p170_p3)  }
   0xc   : > { %v1788_v14 = vld [vmem:[%s2220_s1 + $0x18] sm:$0xff] (!%p170_p3)   ;;  %v1792_v18 = vld [vmem:[%s2220_s1 + $0x20] sm:$0xff] (!%p170_p3)   ;;  %v1796_v22 = vld [vmem:[%s2220_s1 + $0x28] sm:$0xff] (!%p170_p3)  }
   0xd   : > { %1529 = vmatpush3.bf16.msra.mxu0 (!%p170_p3), %v1780_v6  ;;  %v1789_v15 = vld [vmem:[%s2220_s1 + $0x98] sm:$0xff] (!%p170_p3)   ;;  %v1793_v19 = vld [vmem:[%s2220_s1 + $0xa0] sm:$0xff] (!%p170_p3)   ;;  %v1797_v23 = vld [vmem:[%s2220_s1 + $0xa8] sm:$0xff] (!%p170_p3)  }
   0xe   : > { %1641 = vmatpush3.bf16.msra.mxu1 %v1781_v7  ;;  %1530 = vmatprep.subr.bf16.mxu0 %v1782_v8  ;;  %s2228_s25 = smov (!%p205_p4, %s1421_s25), 63  ;;  %v1798_v24 = vld [vmem:[%s2220_s1 + $0x70] sm:$0xff]   ;;  %v1802_v28 = vld [vmem:[%s2220_s1 + $0x78] sm:$0xff]  }
   0xf   : > { %1642 = vmatprep.subr.bf16.mxu1 %v1783_v9  ;;  %v1799_v25 = vld [vmem:[%s2220_s1 + $0xf0] sm:$0xff]   ;;  %s1525_s24 = sshll.u32 %s2228_s25, 4  ;;  %v1803_v29 = vld [vmem:[%s2220_s1 + $0xf8] sm:$0xff]   ;;  %s1425_s11 = sshll.u32 %s2228_s25, 3 }
  0x10   : > { %v1800_v26 = vld [vmem:[%s2220_s1 + $0x30] sm:$0xff]   ;;  %s2063_s12 = scalar_lea.vmem %s2219_s0, %s1525_s24  ;;  %v1804_v30 = vld [vmem:[%s2220_s1 + $0x38] sm:$0xff]   ;;  %s2144_s20 = scalar_lea.vmem %s2222_s3, %s1425_s11 }
  0x11   : > { %1531 = vmatpush3.bf16.msra.mxu0 %v1784_v10  ;;  %v1801_v27 = vld [vmem:[%s2220_s1 + $0xb0] sm:$0xff]   ;;  %v1805_v31 = vld [vmem:[%s2220_s1 + $0xb8] sm:$0xff]  }
  0x12   : > { %1643 = vmatpush3.bf16.msra.mxu1 %v1785_v11  ;;  %1532 = vmatprep.subr.bf16.mxu0 %v1786_v12  ;;  %v1806_v32 = vld [vmem:[%s2063_s12] ss:$16 sps:$4 sm:$0xff]   ;;  %v1808_v33 = vld [vmem:[%s2063_s12 + $0x4] ss:$16 sps:$4 sm:$0xff]   ;;  %v1809_v34 = vld [vmem:[%s2063_s12 + $0x8] ss:$16 sps:$4 sm:$0xff]  }
  0x13   : > { %1644 = vmatprep.subr.bf16.mxu1 %v1787_v13  ;;  %v1811_v35 = vld [vmem:[%s2063_s12 + $0xc] ss:$16 sps:$4 sm:$0xff]   ;;  %975 = vmatprep.mubr.bf16.mxu0 %v1808_v33  ;;  %v1812_v36 = vld [vmem:[%s2063_s12 + $0x24] ss:$16 sps:$4 sm:$0xff]   ;;  %v1816_v38 = vld [vmem:[%s2063_s12 + $0x20] ss:$16 sps:$4 sm:$0xff]  }
  0x14   : > { %1136 = vmatprep.mubr.bf16.mxu1 %v1811_v35  ;;  %v1814_v37 = vld [vmem:[%s2063_s12 + $0x2c] ss:$16 sps:$4 sm:$0xff]   ;;  %v1817_v39 = vld [vmem:[%s2063_s12 + $0x28] ss:$16 sps:$4 sm:$0xff]   ;;  %v1818_v40 = vld [vmem:[%s2063_s12 + $0x44] ss:$16 sps:$4 sm:$0xff]  }
  0x15   : > { %1533 = vmatpush3.bf16.msra.mxu0 %v1788_v14  ;;  %v1820_v41 = vld [vmem:[%s2063_s12 + $0x4c] ss:$16 sps:$4 sm:$0xff]   ;;  %v1822_v42 = vld [vmem:[%s2063_s12 + $0x40] ss:$16 sps:$4 sm:$0xff]   ;;  %v1823_v43 = vld [vmem:[%s2063_s12 + $0x48] ss:$16 sps:$4 sm:$0xff]  }
  0x16   : > { %1645 = vmatpush3.bf16.msra.mxu1 %v1789_v15  ;;  %1534 = vmatprep.subr.bf16.mxu0 %v1790_v16  ;;  %v1824_v44 = vld [vmem:[%s2063_s12 + $0x64] ss:$16 sps:$4 sm:$0xff]   ;;  %v1826_v45 = vld [vmem:[%s2063_s12 + $0x6c] ss:$16 sps:$4 sm:$0xff]   ;;  %v1828_v46 = vld [vmem:[%s2063_s12 + $0x60] ss:$16 sps:$4 sm:$0xff]  }
  0x17   : > { %1646 = vmatprep.subr.bf16.mxu1 %v1791_v17  ;;  %v1829_v47 = vld [vmem:[%s2063_s12 + $0x68] ss:$16 sps:$4 sm:$0xff]   ;;  %v1830_v48 = vld [vmem:[%s2063_s12 + $0x84] ss:$16 sps:$4 sm:$0xff]   ;;  %v1832_v49 = vld [vmem:[%s2063_s12 + $0x8c] ss:$16 sps:$4 sm:$0xff]  }
  0x18   : > { %v1834_v50 = vld [vmem:[%s2063_s12 + $0x80] ss:$16 sps:$4 sm:$0xff]   ;;  %v1835_v51 = vld [vmem:[%s2063_s12 + $0x88] ss:$16 sps:$4 sm:$0xff]   ;;  %v1836_v52 = vld [vmem:[%s2063_s12 + $0xa4] ss:$16 sps:$4 sm:$0xff]  }
  0x19   : > { %1535 = vmatpush3.bf16.msra.mxu0 %v1792_v18  ;;  %v1838_v53 = vld [vmem:[%s2063_s12 + $0xac] ss:$16 sps:$4 sm:$0xff]   ;;  %v1840_v54 = vld [vmem:[%s2063_s12 + $0xa0] ss:$16 sps:$4 sm:$0xff]   ;;  %v1841_v55 = vld [vmem:[%s2063_s12 + $0xa8] ss:$16 sps:$4 sm:$0xff]  }
  0x1a   : > { %1647 = vmatpush3.bf16.msra.mxu1 %v1793_v19  ;;  %1536 = vmatprep.subr.bf16.mxu0 %v1794_v20  ;;  %v1842_v56 = vld [vmem:[%s2063_s12 + $0xc4] ss:$16 sps:$4 sm:$0xff]   ;;  %v1844_v57 = vld [vmem:[%s2063_s12 + $0xcc] ss:$16 sps:$4 sm:$0xff]   ;;  %v1846_v58 = vld [vmem:[%s2063_s12 + $0xc0] ss:$16 sps:$4 sm:$0xff]  }
  0x1b   : > { %1648 = vmatprep.subr.bf16.mxu1 %v1795_v21  ;;  %v1847_v59 = vld [vmem:[%s2063_s12 + $0xc8] ss:$16 sps:$4 sm:$0xff]   ;;  %v1848_v60 = vld [vmem:[%s2063_s12 + $0xe4] ss:$16 sps:$4 sm:$0xff]   ;;  %v1850_v61 = vld [vmem:[%s2063_s12 + $0xec] ss:$16 sps:$4 sm:$0xff]  }
  0x1c   : > { %v1852_v62 = vld [vmem:[%s2063_s12 + $0xe0] ss:$16 sps:$4 sm:$0xff]   ;;  %v1853_v63 = vld [vmem:[%s2063_s12 + $0xe8] ss:$16 sps:$4 sm:$0xff]   ;;  %v1854_v0 = vld [vmem:[%s2063_s12 + $0x104] ss:$16 sps:$4 sm:$0xff]  }
  0x1d   : > { %1537 = vmatpush3.bf16.msra.mxu0 %v1796_v22  ;;  %v1856_v1 = vld [vmem:[%s2063_s12 + $0x10c] ss:$16 sps:$4 sm:$0xff]   ;;  %v1858_v2 = vld [vmem:[%s2063_s12 + $0x100] ss:$16 sps:$4 sm:$0xff]   ;;  %v1859_v3 = vld [vmem:[%s2063_s12 + $0x108] ss:$16 sps:$4 sm:$0xff]  }
  0x1e   : > { %1649 = vmatpush3.bf16.msra.mxu1 %v1797_v23  ;;  %1538 = vmatprep.subr.bf16.mxu0 %v1798_v24  ;;  %v1860_v4 = vld [vmem:[%s2063_s12 + $0x124] ss:$16 sps:$4 sm:$0xff]   ;;  %v1862_v5 = vld [vmem:[%s2063_s12 + $0x12c] ss:$16 sps:$4 sm:$0xff]   ;;  %v1864_v6 = vld [vmem:[%s2063_s12 + $0x120] ss:$16 sps:$4 sm:$0xff]  }
  0x1f   : > { %1650 = vmatprep.subr.bf16.mxu1 %v1799_v25  ;;  %v1865_v7 = vld [vmem:[%s2063_s12 + $0x128] ss:$16 sps:$4 sm:$0xff]   ;;  %v1866_v8 = vld [vmem:[%s2063_s12 + $0x144] ss:$16 sps:$4 sm:$0xff]   ;;  %v1868_v9 = vld [vmem:[%s2063_s12 + $0x14c] ss:$16 sps:$4 sm:$0xff]  }
  0x20   : > { %v1870_v10 = vld [vmem:[%s2063_s12 + $0x140] ss:$16 sps:$4 sm:$0xff]   ;;  %v1871_v11 = vld [vmem:[%s2063_s12 + $0x148] ss:$16 sps:$4 sm:$0xff]   ;;  %v1872_v12 = vld [vmem:[%s2063_s12 + $0x164] ss:$16 sps:$4 sm:$0xff]  }
  0x21   : > { %1539 = vmatpush3.bf16.msra.mxu0 %v1800_v26  ;;  %v1874_v13 = vld [vmem:[%s2063_s12 + $0x16c] ss:$16 sps:$4 sm:$0xff]   ;;  %v1876_v14 = vld [vmem:[%s2063_s12 + $0x160] ss:$16 sps:$4 sm:$0xff]   ;;  %v1877_v15 = vld [vmem:[%s2063_s12 + $0x168] ss:$16 sps:$4 sm:$0xff]  }
  0x22   : > { %1651 = vmatpush3.bf16.msra.mxu1 %v1801_v27  ;;  %1540 = vmatprep.subr.bf16.mxu0 %v1802_v28  ;;  %v1878_v16 = vld [vmem:[%s2063_s12 + $0x184] ss:$16 sps:$4 sm:$0xff]   ;;  %v1880_v17 = vld [vmem:[%s2063_s12 + $0x18c] ss:$16 sps:$4 sm:$0xff]   ;;  %v1882_v18 = vld [vmem:[%s2063_s12 + $0x180] ss:$16 sps:$4 sm:$0xff]  }
  0x23   : > { %1652 = vmatprep.subr.bf16.mxu1 %v1803_v29  ;;  %v1883_v19 = vld [vmem:[%s2063_s12 + $0x188] ss:$16 sps:$4 sm:$0xff]   ;;  %v1884_v20 = vld [vmem:[%s2063_s12 + $0x1a4] ss:$16 sps:$4 sm:$0xff]   ;;  %v1886_v21 = vld [vmem:[%s2063_s12 + $0x1ac] ss:$16 sps:$4 sm:$0xff]  }
  0x24   : > { %v1888_v22 = vld [vmem:[%s2063_s12 + $0x1a0] ss:$16 sps:$4 sm:$0xff]   ;;  %v1889_v23 = vld [vmem:[%s2063_s12 + $0x1a8] ss:$16 sps:$4 sm:$0xff]   ;;  %v1890_v24 = vld [vmem:[%s2063_s12 + $0x1c4] ss:$16 sps:$4 sm:$0xff]  }
  0x25   : > { %1541 = vmatpush3.bf16.msra.mxu0 %v1804_v30  ;;  %v1892_v25 = vld [vmem:[%s2063_s12 + $0x1cc] ss:$16 sps:$4 sm:$0xff]   ;;  %v1894_v26 = vld [vmem:[%s2063_s12 + $0x1c0] ss:$16 sps:$4 sm:$0xff]   ;;  %v1895_v27 = vld [vmem:[%s2063_s12 + $0x1c8] ss:$16 sps:$4 sm:$0xff]  }
  0x26   : > { %1653 = vmatpush3.bf16.msra.mxu1 %v1805_v31  ;;  %v1896_v28 = vld [vmem:[%s2063_s12 + $0x1e4] ss:$16 sps:$4 sm:$0xff]   ;;  %v1898_v29 = vld [vmem:[%s2063_s12 + $0x1ec] ss:$16 sps:$4 sm:$0xff]   ;;  %v1900_v30 = vld [vmem:[%s2063_s12 + $0x1e0] ss:$16 sps:$4 sm:$0xff]  }
  0x27   : > { %v1901_v31 = vld [vmem:[%s2063_s12 + $0x1e8] ss:$16 sps:$4 sm:$0xff]  }
  0x28   : > { %976 = vmatmul.mubr.bf16.vlgmr.msra.gmra.mrb[0].mxu0 %v1806_v32 }
  0x29   : > { %1137 = vmatmul.mubr.bf16.vlgmr.msra.gmra.mrb[0].mxu1 %v1809_v34  ;;  %983 = vmatprep.mubr.bf16.mxu0 %v1812_v36 }
  0x2a   : > { %1144 = vmatprep.mubr.bf16.mxu1 %v1814_v37 }
  0x30   : > { %984 = vmatmul.mubr.bf16.gmra.mrb[4].mxu0 %v1816_v38 }
  0x31   : > { %1145 = vmatmul.mubr.bf16.gmra.mrb[4].mxu1 %v1817_v39  ;;  %991 = vmatprep.mubr.bf16.mxu0 %v1818_v40 }
  0x32   : > { %1152 = vmatprep.mubr.bf16.mxu1 %v1820_v41  ;;  %v2139_v41 = vld [vmem:[%s2221_s2] ss:$0 sm:$0xff] }
  0x38   : > { %992 = vmatmul.mubr.bf16.gmra.mrb[8].mxu0 %v1822_v42 }
  0x39   : > { %1153 = vmatmul.mubr.bf16.gmra.mrb[8].mxu1 %v1823_v43  ;;  %999 = vmatprep.mubr.bf16.mxu0 %v1824_v44 }
  0x3a   : > { %1160 = vmatprep.mubr.bf16.mxu1 %v1826_v45 }
  0x40   : > { %1000 = vmatmul.mubr.bf16.gmra.mrb[12].mxu0 %v1828_v46 }
  0x41   : > { %1161 = vmatmul.mubr.bf16.gmra.mrb[12].mxu1 %v1829_v47  ;;  %1007 = vmatprep.mubr.bf16.mxu0 %v1830_v48 }
  0x42   : > { %1168 = vmatprep.mubr.bf16.mxu1 %v1832_v49 }
  0x48   : > { %1008 = vmatmul.mubr.bf16.gmra.mrb[16].mxu0 %v1834_v50 }
  0x49   : > { %1169 = vmatmul.mubr.bf16.gmra.mrb[16].mxu1 %v1835_v51  ;;  %1015 = vmatprep.mubr.bf16.mxu0 %v1836_v52 }
  0x4a   : > { %1176 = vmatprep.mubr.bf16.mxu1 %v1838_v53 }
  0x50   : > { %1016 = vmatmul.mubr.bf16.gmra.mrb[20].mxu0 %v1840_v54 }
  0x51   : > { %1177 = vmatmul.mubr.bf16.gmra.mrb[20].mxu1 %v1841_v55  ;;  %1023 = vmatprep.mubr.bf16.mxu0 %v1842_v56 }
  0x52   : > { %1184 = vmatprep.mubr.bf16.mxu1 %v1844_v57 }
  0x58   : > { %1024 = vmatmul.mubr.bf16.gmra.mrb[24].mxu0 %v1846_v58 }
  0x59   : > { %1185 = vmatmul.mubr.bf16.gmra.mrb[24].mxu1 %v1847_v59  ;;  %1031 = vmatprep.mubr.bf16.mxu0 %v1848_v60 }
  0x5a   : > { %1192 = vmatprep.mubr.bf16.mxu1 %v1850_v61 }
  0x60   : > { %1032 = vmatmul.mubr.bf16.gmra.mrb[28].mxu0 %v1852_v62 }
  0x61   : > { %1193 = vmatmul.mubr.bf16.gmra.mrb[28].mxu1 %v1853_v63  ;;  %1039 = vmatprep.mubr.bf16.mxu0 %v1854_v0 }
  0x62   : > { %1200 = vmatprep.mubr.bf16.mxu1 %v1856_v1 }
  0x68   : > { %1040 = vmatmul.mubr.bf16.gmra.mrb[32].mxu0 %v1858_v2 }
  0x69   : > { %1201 = vmatmul.mubr.bf16.gmra.mrb[32].mxu1 %v1859_v3  ;;  %1047 = vmatprep.mubr.bf16.mxu0 %v1860_v4 }
  0x6a   : > { %1208 = vmatprep.mubr.bf16.mxu1 %v1862_v5 }
  0x70   : > { %1048 = vmatmul.mubr.bf16.gmra.mrb[36].mxu0 %v1864_v6 }
  0x71   : > { %1209 = vmatmul.mubr.bf16.gmra.mrb[36].mxu1 %v1865_v7  ;;  %1055 = vmatprep.mubr.bf16.mxu0 %v1866_v8 }
  0x72   : > { %1216 = vmatprep.mubr.bf16.mxu1 %v1868_v9 }
  0x78   : > { %1056 = vmatmul.mubr.bf16.gmra.mrb[40].mxu0 %v1870_v10 }
  0x79   : > { %1217 = vmatmul.mubr.bf16.gmra.mrb[40].mxu1 %v1871_v11  ;;  %1063 = vmatprep.mubr.bf16.mxu0 %v1872_v12 }
  0x7a   : > { %1224 = vmatprep.mubr.bf16.mxu1 %v1874_v13 }
  0x80   : > { %1064 = vmatmul.mubr.bf16.gmra.mrb[44].mxu0 %v1876_v14 }
  0x81   : > { %1225 = vmatmul.mubr.bf16.gmra.mrb[44].mxu1 %v1877_v15  ;;  %1071 = vmatprep.mubr.bf16.mxu0 %v1878_v16 }
  0x82   : > { %1232 = vmatprep.mubr.bf16.mxu1 %v1880_v17 }
  0x88   : > { %1072 = vmatmul.mubr.bf16.gmra.mrb[48].mxu0 %v1882_v18 }
  0x89   : > { %1233 = vmatmul.mubr.bf16.gmra.mrb[48].mxu1 %v1883_v19  ;;  %1079 = vmatprep.mubr.bf16.mxu0 %v1884_v20 }
  0x8a   : > { %1240 = vmatprep.mubr.bf16.mxu1 %v1886_v21 }
  0x90   : > { %1080 = vmatmul.mubr.bf16.gmra.mrb[52].mxu0 %v1888_v22 }
  0x91   : > { %1241 = vmatmul.mubr.bf16.gmra.mrb[52].mxu1 %v1889_v23  ;;  %1087 = vmatprep.mubr.bf16.mxu0 %v1890_v24 }
  0x92   : > { %1248 = vmatprep.mubr.bf16.mxu1 %v1892_v25 }
  0x98   : > { %1088 = vmatmul.mubr.bf16.gmra.mrb[56].mxu0 %v1894_v26 }
  0x99   : > { %1249 = vmatmul.mubr.bf16.gmra.mrb[56].mxu1 %v1895_v27  ;;  %1095 = vmatprep.mubr.bf16.mxu0 %v1896_v28 }
  0x9a   : > { %1256 = vmatprep.mubr.bf16.mxu1 %v1898_v29 }
  0xa0   : > { %1096 = vmatmul.mubr.bf16.gmra.mrb[60].mxu0 %v1900_v30 }
  0xa1   : > { %1257 = vmatmul.mubr.bf16.gmra.mrb[60].mxu1 %v1901_v31 }
  0xfb   : > { %v1542_v32 = vpop.f32.mrb[0].mxu0 }
  0xfc   : > { %v1654_v33 = vpop.f32.mrb[0].mxu1  ;;  %v1543_v34 = vpop.f32.mrb[1].mxu0 }
  0xfd   : > { %v1544_v35 = vadd.f32 %v1543_v34, %v1542_v32  ;;  %v1655_v36 = vpop.f32.mrb[1].mxu1  ;;  %v1545_v37 = vpop.f32.mrb[2].mxu0 }
  0xfe   : > { %v1656_v38 = vadd.f32 %v1655_v36, %v1654_v33  ;;  %v1657_v39 = vpop.f32.mrb[2].mxu1  ;;  %v1546_v40 = vpop.f32.mrb[3].mxu0 }
  0xff   : > { %v1547_v42 = vadd.f32 %v1546_v40, %v1545_v37  ;;  %v1658_v43 = vpop.f32.mrb[3].mxu1 }
 0x100   : > { %v1139_v44 = vadd.f32 %v1656_v38, %v1544_v35  ;;  %v1659_v45 = vadd.f32 %v1658_v43, %v1657_v39 }
 0x102   : > { %v1265_v46 = vadd.f32 %v2139_v41, %v1139_v44  ;;  %v1142_v47 = vadd.f32 %v1659_v45, %v1547_v42 }
 0x103   : > { %v1548_v48 = vpop.f32.mrb[4].mxu0 }
 0x104   : > { %1297 = vst [vmem:[%s2144_s20] sm:$0xff] %v1265_v46  ;;  %v1266_v49 = vadd.f32 %v2139_v41, %v1142_v47  ;;  %v1660_v50 = vpop.f32.mrb[4].mxu1  ;;  %v1549_v51 = vpop.f32.mrb[5].mxu0 }
 0x105   : > { %v1550_v52 = vadd.f32 %v1549_v51, %v1548_v48  ;;  %v1661_v53 = vpop.f32.mrb[5].mxu1  ;;  %v1551_v54 = vpop.f32.mrb[6].mxu0 }
 0x106   : > { %1298 = vst [vmem:[%s2144_s20 + $0x8] sm:$0xff] %v1266_v49  ;;  %v1662_v55 = vadd.f32 %v1661_v53, %v1660_v50  ;;  %v1663_v56 = vpop.f32.mrb[6].mxu1  ;;  %v1552_v57 = vpop.f32.mrb[7].mxu0 }
 0x107   : > { %v1553_v58 = vadd.f32 %v1552_v57, %v1551_v54  ;;  %v1664_v59 = vpop.f32.mrb[7].mxu1 }
 0x108   : > { %v1147_v60 = vadd.f32 %v1662_v55, %v1550_v52  ;;  %v1665_v61 = vadd.f32 %v1664_v59, %v1663_v56 }
 0x10a   : > { %v1267_v62 = vadd.f32 %v2139_v41, %v1147_v60  ;;  %v1150_v63 = vadd.f32 %v1665_v61, %v1553_v58 }
 0x10b   : > { %v1554_v0 = vpop.f32.mrb[8].mxu0 }
 0x10c   : > { %1299 = vst [vmem:[%s2144_s20 + $0x10] sm:$0xff] %v1267_v62  ;;  %v1268_v1 = vadd.f32 %v2139_v41, %v1150_v63  ;;  %v1666_v2 = vpop.f32.mrb[8].mxu1  ;;  %v1555_v3 = vpop.f32.mrb[9].mxu0 }
 0x10d   : > { %v1556_v4 = vadd.f32 %v1555_v3, %v1554_v0  ;;  %v1667_v5 = vpop.f32.mrb[9].mxu1  ;;  %v1557_v6 = vpop.f32.mrb[10].mxu0 }
 0x10e   : > { %1300 = vst [vmem:[%s2144_s20 + $0x18] sm:$0xff] %v1268_v1  ;;  %v1668_v7 = vadd.f32 %v1667_v5, %v1666_v2  ;;  %v1669_v8 = vpop.f32.mrb[10].mxu1  ;;  %v1558_v9 = vpop.f32.mrb[11].mxu0 }
 0x10f   : > { %v1559_v10 = vadd.f32 %v1558_v9, %v1557_v6  ;;  %v1670_v11 = vpop.f32.mrb[11].mxu1 }
 0x110   : > { %v1155_v12 = vadd.f32 %v1668_v7, %v1556_v4  ;;  %v1671_v13 = vadd.f32 %v1670_v11, %v1669_v8 }
 0x112   : > { %v1269_v14 = vadd.f32 %v2139_v41, %v1155_v12  ;;  %v1158_v15 = vadd.f32 %v1671_v13, %v1559_v10 }
 0x113   : > { %v1560_v16 = vpop.f32.mrb[12].mxu0 }
 0x114   : > { %1301 = vst [vmem:[%s2144_s20 + $0x20] sm:$0xff] %v1269_v14  ;;  %v1270_v17 = vadd.f32 %v2139_v41, %v1158_v15  ;;  %v1672_v18 = vpop.f32.mrb[12].mxu1  ;;  %v1561_v19 = vpop.f32.mrb[13].mxu0 }
 0x115   : > { %v1562_v20 = vadd.f32 %v1561_v19, %v1560_v16  ;;  %v1673_v21 = vpop.f32.mrb[13].mxu1  ;;  %v1563_v22 = vpop.f32.mrb[14].mxu0 }
 0x116   : > { %1302 = vst [vmem:[%s2144_s20 + $0x28] sm:$0xff] %v1270_v17  ;;  %v1674_v23 = vadd.f32 %v1673_v21, %v1672_v18  ;;  %v1675_v24 = vpop.f32.mrb[14].mxu1  ;;  %v1564_v25 = vpop.f32.mrb[15].mxu0 }
 0x117   : > { %v1565_v26 = vadd.f32 %v1564_v25, %v1563_v22  ;;  %v1676_v27 = vpop.f32.mrb[15].mxu1 }
 0x118   : > { %v1163_v28 = vadd.f32 %v1674_v23, %v1562_v20  ;;  %v1677_v29 = vadd.f32 %v1676_v27, %v1675_v24 }
 0x11a   : > { %v1271_v30 = vadd.f32 %v2139_v41, %v1163_v28  ;;  %v1166_v31 = vadd.f32 %v1677_v29, %v1565_v26 }
 0x11b   : > { %v1566_v32 = vpop.f32.mrb[16].mxu0 }
 0x11c   : > { %1303 = vst [vmem:[%s2144_s20 + $0x30] sm:$0xff] %v1271_v30  ;;  %v1272_v33 = vadd.f32 %v2139_v41, %v1166_v31  ;;  %v1678_v34 = vpop.f32.mrb[16].mxu1  ;;  %v1567_v35 = vpop.f32.mrb[17].mxu0 }
 0x11d   : > { %v1568_v36 = vadd.f32 %v1567_v35, %v1566_v32  ;;  %v1679_v37 = vpop.f32.mrb[17].mxu1  ;;  %v1569_v38 = vpop.f32.mrb[18].mxu0 }
 0x11e   : > { %1304 = vst [vmem:[%s2144_s20 + $0x38] sm:$0xff] %v1272_v33  ;;  %v1680_v39 = vadd.f32 %v1679_v37, %v1678_v34  ;;  %v1681_v40 = vpop.f32.mrb[18].mxu1  ;;  %v1570_v42 = vpop.f32.mrb[19].mxu0 }
 0x11f   : > { %v1571_v43 = vadd.f32 %v1570_v42, %v1569_v38  ;;  %v1682_v44 = vpop.f32.mrb[19].mxu1 }
 0x120   : > { %v1171_v45 = vadd.f32 %v1680_v39, %v1568_v36  ;;  %v1683_v46 = vadd.f32 %v1682_v44, %v1681_v40 }
 0x122   : > { %v1273_v47 = vadd.f32 %v2139_v41, %v1171_v45  ;;  %v1174_v48 = vadd.f32 %v1683_v46, %v1571_v43 }
 0x123   : > { %v1572_v49 = vpop.f32.mrb[20].mxu0 }
 0x124   : > { %1305 = vst [vmem:[%s2144_s20 + $0x40] sm:$0xff] %v1273_v47  ;;  %v1274_v50 = vadd.f32 %v2139_v41, %v1174_v48  ;;  %v1684_v51 = vpop.f32.mrb[20].mxu1  ;;  %v1573_v52 = vpop.f32.mrb[21].mxu0 }
 0x125   : > { %v1574_v53 = vadd.f32 %v1573_v52, %v1572_v49  ;;  %v1685_v54 = vpop.f32.mrb[21].mxu1  ;;  %v1575_v55 = vpop.f32.mrb[22].mxu0 }
 0x126   : > { %1306 = vst [vmem:[%s2144_s20 + $0x48] sm:$0xff] %v1274_v50  ;;  %v1686_v56 = vadd.f32 %v1685_v54, %v1684_v51  ;;  %v1687_v57 = vpop.f32.mrb[22].mxu1  ;;  %v1576_v58 = vpop.f32.mrb[23].mxu0 }
 0x127   : > { %v1577_v59 = vadd.f32 %v1576_v58, %v1575_v55  ;;  %v1688_v60 = vpop.f32.mrb[23].mxu1 }
 0x128   : > { %v1179_v61 = vadd.f32 %v1686_v56, %v1574_v53  ;;  %v1689_v62 = vadd.f32 %v1688_v60, %v1687_v57 }
 0x12a   : > { %v1275_v63 = vadd.f32 %v2139_v41, %v1179_v61  ;;  %v1182_v0 = vadd.f32 %v1689_v62, %v1577_v59 }
 0x12b   : > { %v1578_v1 = vpop.f32.mrb[24].mxu0 }
 0x12c   : > { %1307 = vst [vmem:[%s2144_s20 + $0x50] sm:$0xff] %v1275_v63  ;;  %v1276_v2 = vadd.f32 %v2139_v41, %v1182_v0  ;;  %v1690_v3 = vpop.f32.mrb[24].mxu1  ;;  %v1579_v4 = vpop.f32.mrb[25].mxu0 }
 0x12d   : > { %v1580_v5 = vadd.f32 %v1579_v4, %v1578_v1  ;;  %v1691_v6 = vpop.f32.mrb[25].mxu1  ;;  %v1581_v7 = vpop.f32.mrb[26].mxu0 }
 0x12e   : > { %1308 = vst [vmem:[%s2144_s20 + $0x58] sm:$0xff] %v1276_v2  ;;  %v1692_v8 = vadd.f32 %v1691_v6, %v1690_v3  ;;  %v1693_v9 = vpop.f32.mrb[26].mxu1  ;;  %v1582_v10 = vpop.f32.mrb[27].mxu0 }
 0x12f   : > { %v1583_v11 = vadd.f32 %v1582_v10, %v1581_v7  ;;  %v1694_v12 = vpop.f32.mrb[27].mxu1 }
 0x130   : > { %v1187_v13 = vadd.f32 %v1692_v8, %v1580_v5  ;;  %v1695_v14 = vadd.f32 %v1694_v12, %v1693_v9 }
 0x132   : > { %v1277_v15 = vadd.f32 %v2139_v41, %v1187_v13  ;;  %v1190_v16 = vadd.f32 %v1695_v14, %v1583_v11 }
 0x133   : > { %v1584_v17 = vpop.f32.mrb[28].mxu0 }
 0x134   : > { %1309 = vst [vmem:[%s2144_s20 + $0x60] sm:$0xff] %v1277_v15  ;;  %v1278_v18 = vadd.f32 %v2139_v41, %v1190_v16  ;;  %v1696_v19 = vpop.f32.mrb[28].mxu1  ;;  %v1585_v20 = vpop.f32.mrb[29].mxu0 }
 0x135   : > { %v1586_v21 = vadd.f32 %v1585_v20, %v1584_v17  ;;  %v1697_v22 = vpop.f32.mrb[29].mxu1  ;;  %v1587_v23 = vpop.f32.mrb[30].mxu0 }
 0x136   : > { %1310 = vst [vmem:[%s2144_s20 + $0x68] sm:$0xff] %v1278_v18  ;;  %v1698_v24 = vadd.f32 %v1697_v22, %v1696_v19  ;;  %v1699_v25 = vpop.f32.mrb[30].mxu1  ;;  %v1588_v26 = vpop.f32.mrb[31].mxu0 }
 0x137   : > { %v1589_v27 = vadd.f32 %v1588_v26, %v1587_v23  ;;  %v1700_v28 = vpop.f32.mrb[31].mxu1 }
 0x138   : > { %v1195_v29 = vadd.f32 %v1698_v24, %v1586_v21  ;;  %v1701_v30 = vadd.f32 %v1700_v28, %v1699_v25 }
 0x13a   : > { %v1279_v31 = vadd.f32 %v2139_v41, %v1195_v29  ;;  %v1198_v32 = vadd.f32 %v1701_v30, %v1589_v27 }
 0x13b   : > { %v1590_v33 = vpop.f32.mrb[32].mxu0 }
 0x13c   : > { %1311 = vst [vmem:[%s2144_s20 + $0x70] sm:$0xff] %v1279_v31  ;;  %v1280_v34 = vadd.f32 %v2139_v41, %v1198_v32  ;;  %v1702_v35 = vpop.f32.mrb[32].mxu1  ;;  %v1591_v36 = vpop.f32.mrb[33].mxu0 }
 0x13d   : > { %v1592_v37 = vadd.f32 %v1591_v36, %v1590_v33  ;;  %v1703_v38 = vpop.f32.mrb[33].mxu1  ;;  %v1593_v39 = vpop.f32.mrb[34].mxu0 }
 0x13e   : > { %1312 = vst [vmem:[%s2144_s20 + $0x78] sm:$0xff] %v1280_v34  ;;  %v1704_v40 = vadd.f32 %v1703_v38, %v1702_v35  ;;  %v1705_v42 = vpop.f32.mrb[34].mxu1  ;;  %v1594_v43 = vpop.f32.mrb[35].mxu0 }
 0x13f   : > { %v1595_v44 = vadd.f32 %v1594_v43, %v1593_v39  ;;  %v1706_v45 = vpop.f32.mrb[35].mxu1 }
 0x140   : > { %v1203_v46 = vadd.f32 %v1704_v40, %v1592_v37  ;;  %v1707_v47 = vadd.f32 %v1706_v45, %v1705_v42 }
 0x142   : > { %v1281_v48 = vadd.f32 %v2139_v41, %v1203_v46  ;;  %v1206_v49 = vadd.f32 %v1707_v47, %v1595_v44 }
 0x143   : > { %v1596_v50 = vpop.f32.mrb[36].mxu0 }
 0x144   : > { %1313 = vst [vmem:[%s2144_s20 + $0x80] sm:$0xff] %v1281_v48  ;;  %v1282_v51 = vadd.f32 %v2139_v41, %v1206_v49  ;;  %v1708_v52 = vpop.f32.mrb[36].mxu1  ;;  %v1597_v53 = vpop.f32.mrb[37].mxu0 }
 0x145   : > { %v1598_v54 = vadd.f32 %v1597_v53, %v1596_v50  ;;  %v1709_v55 = vpop.f32.mrb[37].mxu1  ;;  %v1599_v56 = vpop.f32.mrb[38].mxu0 }
 0x146   : > { %1314 = vst [vmem:[%s2144_s20 + $0x88] sm:$0xff] %v1282_v51  ;;  %v1710_v57 = vadd.f32 %v1709_v55, %v1708_v52  ;;  %v1711_v58 = vpop.f32.mrb[38].mxu1  ;;  %v1600_v59 = vpop.f32.mrb[39].mxu0 }
 0x147   : > { %v1601_v60 = vadd.f32 %v1600_v59, %v1599_v56  ;;  %v1712_v61 = vpop.f32.mrb[39].mxu1 }
 0x148   : > { %v1211_v62 = vadd.f32 %v1710_v57, %v1598_v54  ;;  %v1713_v63 = vadd.f32 %v1712_v61, %v1711_v58 }
 0x14a   : > { %v1283_v0 = vadd.f32 %v2139_v41, %v1211_v62  ;;  %v1214_v1 = vadd.f32 %v1713_v63, %v1601_v60 }
 0x14b   : > { %v1602_v2 = vpop.f32.mrb[40].mxu0 }
 0x14c   : > { %1315 = vst [vmem:[%s2144_s20 + $0x90] sm:$0xff] %v1283_v0  ;;  %v1284_v3 = vadd.f32 %v2139_v41, %v1214_v1  ;;  %v1714_v4 = vpop.f32.mrb[40].mxu1  ;;  %v1603_v5 = vpop.f32.mrb[41].mxu0 }
 0x14d   : > { %v1604_v6 = vadd.f32 %v1603_v5, %v1602_v2  ;;  %v1715_v7 = vpop.f32.mrb[41].mxu1  ;;  %v1605_v8 = vpop.f32.mrb[42].mxu0 }
 0x14e   : > { %1316 = vst [vmem:[%s2144_s20 + $0x98] sm:$0xff] %v1284_v3  ;;  %v1716_v9 = vadd.f32 %v1715_v7, %v1714_v4  ;;  %v1717_v10 = vpop.f32.mrb[42].mxu1  ;;  %v1606_v11 = vpop.f32.mrb[43].mxu0 }
 0x14f   : > { %v1607_v12 = vadd.f32 %v1606_v11, %v1605_v8  ;;  %v1718_v13 = vpop.f32.mrb[43].mxu1 }
 0x150   : > { %v1219_v14 = vadd.f32 %v1716_v9, %v1604_v6  ;;  %v1719_v15 = vadd.f32 %v1718_v13, %v1717_v10 }
 0x152   : > { %v1285_v16 = vadd.f32 %v2139_v41, %v1219_v14  ;;  %v1222_v17 = vadd.f32 %v1719_v15, %v1607_v12 }
 0x153   : > { %v1608_v18 = vpop.f32.mrb[44].mxu0 }
 0x154   : > { %1317 = vst [vmem:[%s2144_s20 + $0xa0] sm:$0xff] %v1285_v16  ;;  %v1286_v19 = vadd.f32 %v2139_v41, %v1222_v17  ;;  %v1720_v20 = vpop.f32.mrb[44].mxu1  ;;  %v1609_v21 = vpop.f32.mrb[45].mxu0 }
 0x155   : > { %v1610_v22 = vadd.f32 %v1609_v21, %v1608_v18  ;;  %v1721_v23 = vpop.f32.mrb[45].mxu1  ;;  %v1611_v24 = vpop.f32.mrb[46].mxu0 }
 0x156   : > { %1318 = vst [vmem:[%s2144_s20 + $0xa8] sm:$0xff] %v1286_v19  ;;  %v1722_v25 = vadd.f32 %v1721_v23, %v1720_v20  ;;  %v1723_v26 = vpop.f32.mrb[46].mxu1  ;;  %v1612_v27 = vpop.f32.mrb[47].mxu0 }
 0x157   : > { %v1613_v28 = vadd.f32 %v1612_v27, %v1611_v24  ;;  %v1724_v29 = vpop.f32.mrb[47].mxu1 }
 0x158   : > { %v1227_v30 = vadd.f32 %v1722_v25, %v1610_v22  ;;  %v1725_v31 = vadd.f32 %v1724_v29, %v1723_v26 }
 0x15a   : > { %v1287_v32 = vadd.f32 %v2139_v41, %v1227_v30  ;;  %v1230_v33 = vadd.f32 %v1725_v31, %v1613_v28 }
 0x15b   : > { %v1614_v34 = vpop.f32.mrb[48].mxu0 }
 0x15c   : > { %1319 = vst [vmem:[%s2144_s20 + $0xb0] sm:$0xff] %v1287_v32  ;;  %v1288_v35 = vadd.f32 %v2139_v41, %v1230_v33  ;;  %v1726_v36 = vpop.f32.mrb[48].mxu1  ;;  %v1615_v37 = vpop.f32.mrb[49].mxu0 }
 0x15d   : > { %v1616_v38 = vadd.f32 %v1615_v37, %v1614_v34  ;;  %v1727_v39 = vpop.f32.mrb[49].mxu1  ;;  %v1617_v40 = vpop.f32.mrb[50].mxu0 }
 0x15e   : > { %1320 = vst [vmem:[%s2144_s20 + $0xb8] sm:$0xff] %v1288_v35  ;;  %v1728_v42 = vadd.f32 %v1727_v39, %v1726_v36  ;;  %v1729_v43 = vpop.f32.mrb[50].mxu1  ;;  %v1618_v44 = vpop.f32.mrb[51].mxu0 }
 0x15f   : > { %v1619_v45 = vadd.f32 %v1618_v44, %v1617_v40  ;;  %v1730_v46 = vpop.f32.mrb[51].mxu1 }
 0x160   : > { %v1235_v47 = vadd.f32 %v1728_v42, %v1616_v38  ;;  %v1731_v48 = vadd.f32 %v1730_v46, %v1729_v43 }
 0x162   : > { %v1289_v49 = vadd.f32 %v2139_v41, %v1235_v47  ;;  %v1238_v50 = vadd.f32 %v1731_v48, %v1619_v45 }
 0x163   : > { %v1620_v51 = vpop.f32.mrb[52].mxu0 }
 0x164   : > { %1321 = vst [vmem:[%s2144_s20 + $0xc0] sm:$0xff] %v1289_v49  ;;  %v1290_v52 = vadd.f32 %v2139_v41, %v1238_v50  ;;  %v1732_v53 = vpop.f32.mrb[52].mxu1  ;;  %v1621_v54 = vpop.f32.mrb[53].mxu0 }
 0x165   : > { %v1622_v55 = vadd.f32 %v1621_v54, %v1620_v51  ;;  %v1733_v56 = vpop.f32.mrb[53].mxu1  ;;  %v1623_v57 = vpop.f32.mrb[54].mxu0 }
 0x166   : > { %1322 = vst [vmem:[%s2144_s20 + $0xc8] sm:$0xff] %v1290_v52  ;;  %v1734_v58 = vadd.f32 %v1733_v56, %v1732_v53  ;;  %v1735_v59 = vpop.f32.mrb[54].mxu1  ;;  %v1624_v60 = vpop.f32.mrb[55].mxu0 }
 0x167   : > { %v1625_v61 = vadd.f32 %v1624_v60, %v1623_v57  ;;  %v1736_v62 = vpop.f32.mrb[55].mxu1 }
 0x168   : > { %v1243_v63 = vadd.f32 %v1734_v58, %v1622_v55  ;;  %v1737_v0 = vadd.f32 %v1736_v62, %v1735_v59 }
 0x16a   : > { %v1291_v1 = vadd.f32 %v2139_v41, %v1243_v63  ;;  %v1246_v2 = vadd.f32 %v1737_v0, %v1625_v61 }
 0x16b   : > { %v1626_v3 = vpop.f32.mrb[56].mxu0 }
 0x16c   : > { %1323 = vst [vmem:[%s2144_s20 + $0xd0] sm:$0xff] %v1291_v1  ;;  %v1292_v4 = vadd.f32 %v2139_v41, %v1246_v2  ;;  %v1738_v5 = vpop.f32.mrb[56].mxu1  ;;  %v1627_v6 = vpop.f32.mrb[57].mxu0 }
 0x16d   : > { %v1628_v7 = vadd.f32 %v1627_v6, %v1626_v3  ;;  %v1739_v8 = vpop.f32.mrb[57].mxu1  ;;  %v1629_v9 = vpop.f32.mrb[58].mxu0 }
 0x16e   : > { %1324 = vst [vmem:[%s2144_s20 + $0xd8] sm:$0xff] %v1292_v4  ;;  %v1740_v10 = vadd.f32 %v1739_v8, %v1738_v5  ;;  %v1741_v11 = vpop.f32.mrb[58].mxu1  ;;  %v1630_v12 = vpop.f32.mrb[59].mxu0 }
 0x16f   : > { %v1631_v13 = vadd.f32 %v1630_v12, %v1629_v9  ;;  %v1742_v14 = vpop.f32.mrb[59].mxu1 }
 0x170   : > { %v1251_v15 = vadd.f32 %v1740_v10, %v1628_v7  ;;  %v1743_v16 = vadd.f32 %v1742_v14, %v1741_v11 }
 0x172   : > { %v1293_v17 = vadd.f32 %v2139_v41, %v1251_v15  ;;  %v1254_v18 = vadd.f32 %v1743_v16, %v1631_v13 }
 0x173   : > { %v1632_v19 = vpop.f32.mrb[60].mxu0 }
 0x174   : > { %1325 = vst [vmem:[%s2144_s20 + $0xe0] sm:$0xff] %v1293_v17  ;;  %v1294_v20 = vadd.f32 %v2139_v41, %v1254_v18  ;;  %v1744_v21 = vpop.f32.mrb[60].mxu1  ;;  %v1633_v22 = vpop.f32.mrb[61].mxu0 }
 0x175   : > { %v1634_v23 = vadd.f32 %v1633_v22, %v1632_v19  ;;  %v1745_v24 = vpop.f32.mrb[61].mxu1  ;;  %v1635_v25 = vpop.f32.mrb[62].mxu0 }
 0x176   : > { %1326 = vst [vmem:[%s2144_s20 + $0xe8] sm:$0xff] %v1294_v20  ;;  %v1746_v26 = vadd.f32 %v1745_v24, %v1744_v21  ;;  %v1747_v27 = vpop.f32.mrb[62].mxu1  ;;  %v1636_v28 = vpop.f32.mrb[63].mxu0 }
 0x177   : > { %v1637_v29 = vadd.f32 %v1636_v28, %v1635_v25  ;;  %v1748_v30 = vpop.f32.mrb[63].mxu1 }
 0x178   : > { %v1259_v31 = vadd.f32 %v1746_v26, %v1634_v23  ;;  %v1749_v32 = vadd.f32 %v1748_v30, %v1747_v27 }
 0x17a   : > { %v1295_v33 = vadd.f32 %v2139_v41, %v1259_v31  ;;  %v1262_v34 = vadd.f32 %v1749_v32, %v1637_v29 }
 0x17c   : > { %1327 = vst [vmem:[%s2144_s20 + $0xf0] sm:$0xff] %v1295_v33  ;;  %v1296_v35 = vadd.f32 %v2139_v41, %v1262_v34 }
 0x17e   : > { %1328 = vst [vmem:[%s2144_s20 + $0xf8] sm:$0xff] %v1296_v35 }
 0x17f PF: > { %s13_s14 = sadd.s32 1, %s1924_s14   ;;  %s2223_s12 = smov %s1920_s13 }
 0x180   : > { %p10_p5 = scmp.ge.s32.totalorder %s13_s14, 4   ;;  %s2224_s13 = smov %s2226_s15 }
 0x182   :  { %12 = sbr.rel (!%p10_p5) target bundleno = 2 (0x2), region = 69 }

// kernel: _lambda_.5
= control target key start
LH: loop header
LB: loop body
LE: loop exit
PB: predicated region body
PF: predicated region fallthrough
CT: control target
= control target key end

     0   :  { %s2364_s12 = smov 0   ;;  %s2366_s13 = smov 0   ;;  %s2621_s0 = inlined_call_operand.vmem [shape: bf16[512,512], index: 0, kind: input, shape index: {}]   ;;  %s2622_s1 = inlined_call_operand.vmem [shape: bf16[512,128], index: 1, kind: input, shape index: {}]   ;;  %s2623_s2 = inlined_call_operand.vmem [shape: f32[1,128], index: 2, kind: input, shape index: {}]   ;;  %s2624_s3 = inlined_call_operand.vmem [shape: bf16[512,128], index: 3, kind: output, shape index: {}]  }
   0x1   :  { %s2368_s14 = smov 0  }
   0x2 LB: > { %s25_s15 = sadd.s32 1, %s2338_s13  ;;  %p1679_p0 = scmp.ge.s32.totalorder %s2342_s14, 1  ;;  %s2342_s14 = sphi %s2368_s14, %s13_s14   ;;  %s2338_s13 = sphi %s2366_s13, %s2626_s13   ;;  %s2334_s12 = sphi %s2364_s12, %s2625_s12  }
   0x3   : > { %p27_p1 = scmp.ge.s32.totalorder %s25_s15, 2  ;;  %p169_p2 = scmp.lt.s32.totalorder %s2342_s14, 3 }
   0x5   : > { %s2628_s15 = smov (%p27_p1, %s25_s15), 0  ;;  %p170_p3 = pnand %p1679_p0, %p169_p2 }
   0x6   : > { %v2192_v0 = vld [vmem:[%s2622_s1 + $0x40] sm:$0xff] (!%p170_p3)   ;;  %v2196_v4 = vld [vmem:[%s2622_s1 + $0x48] sm:$0xff] (!%p170_p3)   ;;  %v2200_v8 = vld [vmem:[%s2622_s1 + $0x50] sm:$0xff] (!%p170_p3)   ;;  %s1680_s25 = sshll.u32 (!%p170_p3), %s2334_s12, 5 }
   0x7   : > { %173 = sbr.rel (%p170_p3) target bundleno = 387 (0x183), region = 32  ;;  %v2193_v1 = vld [vmem:[%s2622_s1 + $0xc0] sm:$0xff] (!%p170_p3)   ;;  %1944 = vmatprep.subr.bf16.mxu0 (!%p170_p3), %v2192_v0  ;;  %v2197_v5 = vld [vmem:[%s2622_s1 + $0xc8] sm:$0xff] (!%p170_p3)   ;;  %v2201_v9 = vld [vmem:[%s2622_s1 + $0xd0] sm:$0xff] (!%p170_p3)   ;;  %p205_p4 = scmp.lt.s32.totalorder (!%p170_p3), %s1680_s25, 63 }
   0x8   : > { %v2194_v2 = vld [vmem:[%s2622_s1] sm:$0xff] (!%p170_p3)   ;;  %2056 = vmatprep.subr.bf16.mxu1 (!%p170_p3), %v2193_v1  ;;  %v2198_v6 = vld [vmem:[%s2622_s1 + $0x8] sm:$0xff] (!%p170_p3)   ;;  %v2202_v10 = vld [vmem:[%s2622_s1 + $0x10] sm:$0xff] (!%p170_p3)  }
   0x9   : > { %v2195_v3 = vld [vmem:[%s2622_s1 + $0x80] sm:$0xff] (!%p170_p3)   ;;  %1945 = vmatpush3.bf16.msra.mxu0 (!%p170_p3), %v2194_v2  ;;  %v2199_v7 = vld [vmem:[%s2622_s1 + $0x88] sm:$0xff] (!%p170_p3)   ;;  %v2203_v11 = vld [vmem:[%s2622_s1 + $0x90] sm:$0xff] (!%p170_p3)  }
   0xa   : > { %2057 = vmatpush3.bf16.msra.mxu1 (!%p170_p3), %v2195_v3  ;;  %1946 = vmatprep.subr.bf16.mxu0 (!%p170_p3), %v2196_v4  ;;  %v2204_v12 = vld [vmem:[%s2622_s1 + $0x58] sm:$0xff] (!%p170_p3)   ;;  %v2208_v16 = vld [vmem:[%s2622_s1 + $0x60] sm:$0xff] (!%p170_p3)   ;;  %v2212_v20 = vld [vmem:[%s2622_s1 + $0x68] sm:$0xff] (!%p170_p3)  }
   0xb   : > { %2058 = vmatprep.subr.bf16.mxu1 (!%p170_p3), %v2197_v5  ;;  %v2205_v13 = vld [vmem:[%s2622_s1 + $0xd8] sm:$0xff] (!%p170_p3)   ;;  %v2209_v17 = vld [vmem:[%s2622_s1 + $0xe0] sm:$0xff] (!%p170_p3)   ;;  %v2213_v21 = vld [vmem:[%s2622_s1 + $0xe8] sm:$0xff] (!%p170_p3)  }
   0xc   : > { %v2206_v14 = vld [vmem:[%s2622_s1 + $0x18] sm:$0xff] (!%p170_p3)   ;;  %v2210_v18 = vld [vmem:[%s2622_s1 + $0x20] sm:$0xff] (!%p170_p3)   ;;  %v2214_v22 = vld [vmem:[%s2622_s1 + $0x28] sm:$0xff] (!%p170_p3)  }
   0xd   : > { %1947 = vmatpush3.bf16.msra.mxu0 (!%p170_p3), %v2198_v6  ;;  %v2207_v15 = vld [vmem:[%s2622_s1 + $0x98] sm:$0xff] (!%p170_p3)   ;;  %v2211_v19 = vld [vmem:[%s2622_s1 + $0xa0] sm:$0xff] (!%p170_p3)   ;;  %v2215_v23 = vld [vmem:[%s2622_s1 + $0xa8] sm:$0xff] (!%p170_p3)  }
   0xe   : > { %2059 = vmatpush3.bf16.msra.mxu1 %v2199_v7  ;;  %1948 = vmatprep.subr.bf16.mxu0 %v2200_v8  ;;  %s2630_s25 = smov (!%p205_p4, %s1680_s25), 63  ;;  %v2216_v24 = vld [vmem:[%s2622_s1 + $0x70] sm:$0xff]   ;;  %v2220_v28 = vld [vmem:[%s2622_s1 + $0x78] sm:$0xff]  }
   0xf   : > { %2060 = vmatprep.subr.bf16.mxu1 %v2201_v9  ;;  %v2217_v25 = vld [vmem:[%s2622_s1 + $0xf0] sm:$0xff]   ;;  %s1816_s24 = sshll.u32 %s2630_s25, 4  ;;  %v2221_v29 = vld [vmem:[%s2622_s1 + $0xf8] sm:$0xff]   ;;  %s1684_s17 = sshll.u32 %s2630_s25, 2 }
  0x10   : > { %v2218_v26 = vld [vmem:[%s2622_s1 + $0x30] sm:$0xff]   ;;  %s2481_s12 = scalar_lea.vmem %s2621_s0, %s1816_s24  ;;  %v2222_v30 = vld [vmem:[%s2622_s1 + $0x38] sm:$0xff]   ;;  %s2564_s20 = scalar_lea.vmem %s2624_s3, %s1684_s17 }
  0x11   : > { %1949 = vmatpush3.bf16.msra.mxu0 %v2202_v10  ;;  %v2219_v27 = vld [vmem:[%s2622_s1 + $0xb0] sm:$0xff]   ;;  %v2223_v31 = vld [vmem:[%s2622_s1 + $0xb8] sm:$0xff]  }
  0x12   : > { %2061 = vmatpush3.bf16.msra.mxu1 %v2203_v11  ;;  %1950 = vmatprep.subr.bf16.mxu0 %v2204_v12  ;;  %v2224_v32 = vld [vmem:[%s2481_s12] ss:$16 sps:$4 sm:$0xff]   ;;  %v2226_v33 = vld [vmem:[%s2481_s12 + $0x4] ss:$16 sps:$4 sm:$0xff]   ;;  %v2227_v34 = vld [vmem:[%s2481_s12 + $0x8] ss:$16 sps:$4 sm:$0xff]  }
  0x13   : > { %2062 = vmatprep.subr.bf16.mxu1 %v2205_v13  ;;  %v2229_v35 = vld [vmem:[%s2481_s12 + $0xc] ss:$16 sps:$4 sm:$0xff]   ;;  %968 = vmatprep.mubr.bf16.mxu0 %v2226_v33  ;;  %v2230_v36 = vld [vmem:[%s2481_s12 + $0x24] ss:$16 sps:$4 sm:$0xff]   ;;  %v2234_v38 = vld [vmem:[%s2481_s12 + $0x20] ss:$16 sps:$4 sm:$0xff]  }
  0x14   : > { %1129 = vmatprep.mubr.bf16.mxu1 %v2229_v35  ;;  %v2232_v37 = vld [vmem:[%s2481_s12 + $0x2c] ss:$16 sps:$4 sm:$0xff]   ;;  %v2235_v39 = vld [vmem:[%s2481_s12 + $0x28] ss:$16 sps:$4 sm:$0xff]   ;;  %v2236_v40 = vld [vmem:[%s2481_s12 + $0x44] ss:$16 sps:$4 sm:$0xff]  }
  0x15   : > { %1951 = vmatpush3.bf16.msra.mxu0 %v2206_v14  ;;  %v2238_v41 = vld [vmem:[%s2481_s12 + $0x4c] ss:$16 sps:$4 sm:$0xff]   ;;  %v2240_v42 = vld [vmem:[%s2481_s12 + $0x40] ss:$16 sps:$4 sm:$0xff]   ;;  %v2241_v43 = vld [vmem:[%s2481_s12 + $0x48] ss:$16 sps:$4 sm:$0xff]  }
  0x16   : > { %2063 = vmatpush3.bf16.msra.mxu1 %v2207_v15  ;;  %1952 = vmatprep.subr.bf16.mxu0 %v2208_v16  ;;  %v2242_v44 = vld [vmem:[%s2481_s12 + $0x64] ss:$16 sps:$4 sm:$0xff]   ;;  %v2244_v45 = vld [vmem:[%s2481_s12 + $0x6c] ss:$16 sps:$4 sm:$0xff]   ;;  %v2246_v46 = vld [vmem:[%s2481_s12 + $0x60] ss:$16 sps:$4 sm:$0xff]  }
  0x17   : > { %2064 = vmatprep.subr.bf16.mxu1 %v2209_v17  ;;  %v2247_v47 = vld [vmem:[%s2481_s12 + $0x68] ss:$16 sps:$4 sm:$0xff]   ;;  %v2248_v48 = vld [vmem:[%s2481_s12 + $0x84] ss:$16 sps:$4 sm:$0xff]   ;;  %v2250_v49 = vld [vmem:[%s2481_s12 + $0x8c] ss:$16 sps:$4 sm:$0xff]  }
  0x18   : > { %v2252_v50 = vld [vmem:[%s2481_s12 + $0x80] ss:$16 sps:$4 sm:$0xff]   ;;  %v2253_v51 = vld [vmem:[%s2481_s12 + $0x88] ss:$16 sps:$4 sm:$0xff]   ;;  %v2254_v52 = vld [vmem:[%s2481_s12 + $0xa4] ss:$16 sps:$4 sm:$0xff]  }
  0x19   : > { %1953 = vmatpush3.bf16.msra.mxu0 %v2210_v18  ;;  %v2256_v53 = vld [vmem:[%s2481_s12 + $0xac] ss:$16 sps:$4 sm:$0xff]   ;;  %v2258_v54 = vld [vmem:[%s2481_s12 + $0xa0] ss:$16 sps:$4 sm:$0xff]   ;;  %v2259_v55 = vld [vmem:[%s2481_s12 + $0xa8] ss:$16 sps:$4 sm:$0xff]  }
  0x1a   : > { %2065 = vmatpush3.bf16.msra.mxu1 %v2211_v19  ;;  %1954 = vmatprep.subr.bf16.mxu0 %v2212_v20  ;;  %v2260_v56 = vld [vmem:[%s2481_s12 + $0xc4] ss:$16 sps:$4 sm:$0xff]   ;;  %v2262_v57 = vld [vmem:[%s2481_s12 + $0xcc] ss:$16 sps:$4 sm:$0xff]   ;;  %v2264_v58 = vld [vmem:[%s2481_s12 + $0xc0] ss:$16 sps:$4 sm:$0xff]  }
  0x1b   : > { %2066 = vmatprep.subr.bf16.mxu1 %v2213_v21  ;;  %v2265_v59 = vld [vmem:[%s2481_s12 + $0xc8] ss:$16 sps:$4 sm:$0xff]   ;;  %v2266_v60 = vld [vmem:[%s2481_s12 + $0xe4] ss:$16 sps:$4 sm:$0xff]   ;;  %v2268_v61 = vld [vmem:[%s2481_s12 + $0xec] ss:$16 sps:$4 sm:$0xff]  }
  0x1c   : > { %v2270_v62 = vld [vmem:[%s2481_s12 + $0xe0] ss:$16 sps:$4 sm:$0xff]   ;;  %v2271_v63 = vld [vmem:[%s2481_s12 + $0xe8] ss:$16 sps:$4 sm:$0xff]   ;;  %v2272_v0 = vld [vmem:[%s2481_s12 + $0x104] ss:$16 sps:$4 sm:$0xff]  }
  0x1d   : > { %1955 = vmatpush3.bf16.msra.mxu0 %v2214_v22  ;;  %v2274_v1 = vld [vmem:[%s2481_s12 + $0x10c] ss:$16 sps:$4 sm:$0xff]   ;;  %v2276_v2 = vld [vmem:[%s2481_s12 + $0x100] ss:$16 sps:$4 sm:$0xff]   ;;  %v2277_v3 = vld [vmem:[%s2481_s12 + $0x108] ss:$16 sps:$4 sm:$0xff]  }
  0x1e   : > { %2067 = vmatpush3.bf16.msra.mxu1 %v2215_v23  ;;  %1956 = vmatprep.subr.bf16.mxu0 %v2216_v24  ;;  %v2278_v4 = vld [vmem:[%s2481_s12 + $0x124] ss:$16 sps:$4 sm:$0xff]   ;;  %v2280_v5 = vld [vmem:[%s2481_s12 + $0x12c] ss:$16 sps:$4 sm:$0xff]   ;;  %v2282_v6 = vld [vmem:[%s2481_s12 + $0x120] ss:$16 sps:$4 sm:$0xff]  }
  0x1f   : > { %2068 = vmatprep.subr.bf16.mxu1 %v2217_v25  ;;  %v2283_v7 = vld [vmem:[%s2481_s12 + $0x128] ss:$16 sps:$4 sm:$0xff]   ;;  %v2284_v8 = vld [vmem:[%s2481_s12 + $0x144] ss:$16 sps:$4 sm:$0xff]   ;;  %v2286_v9 = vld [vmem:[%s2481_s12 + $0x14c] ss:$16 sps:$4 sm:$0xff]  }
  0x20   : > { %v2288_v10 = vld [vmem:[%s2481_s12 + $0x140] ss:$16 sps:$4 sm:$0xff]   ;;  %v2289_v11 = vld [vmem:[%s2481_s12 + $0x148] ss:$16 sps:$4 sm:$0xff]   ;;  %v2290_v12 = vld [vmem:[%s2481_s12 + $0x164] ss:$16 sps:$4 sm:$0xff]  }
  0x21   : > { %1957 = vmatpush3.bf16.msra.mxu0 %v2218_v26  ;;  %v2292_v13 = vld [vmem:[%s2481_s12 + $0x16c] ss:$16 sps:$4 sm:$0xff]   ;;  %v2294_v14 = vld [vmem:[%s2481_s12 + $0x160] ss:$16 sps:$4 sm:$0xff]   ;;  %v2295_v15 = vld [vmem:[%s2481_s12 + $0x168] ss:$16 sps:$4 sm:$0xff]  }
  0x22   : > { %2069 = vmatpush3.bf16.msra.mxu1 %v2219_v27  ;;  %1958 = vmatprep.subr.bf16.mxu0 %v2220_v28  ;;  %v2296_v16 = vld [vmem:[%s2481_s12 + $0x184] ss:$16 sps:$4 sm:$0xff]   ;;  %v2298_v17 = vld [vmem:[%s2481_s12 + $0x18c] ss:$16 sps:$4 sm:$0xff]   ;;  %v2300_v18 = vld [vmem:[%s2481_s12 + $0x180] ss:$16 sps:$4 sm:$0xff]  }
  0x23   : > { %2070 = vmatprep.subr.bf16.mxu1 %v2221_v29  ;;  %v2301_v19 = vld [vmem:[%s2481_s12 + $0x188] ss:$16 sps:$4 sm:$0xff]   ;;  %v2302_v20 = vld [vmem:[%s2481_s12 + $0x1a4] ss:$16 sps:$4 sm:$0xff]   ;;  %v2304_v21 = vld [vmem:[%s2481_s12 + $0x1ac] ss:$16 sps:$4 sm:$0xff]  }
  0x24   : > { %v2306_v22 = vld [vmem:[%s2481_s12 + $0x1a0] ss:$16 sps:$4 sm:$0xff]   ;;  %v2307_v23 = vld [vmem:[%s2481_s12 + $0x1a8] ss:$16 sps:$4 sm:$0xff]   ;;  %v2308_v24 = vld [vmem:[%s2481_s12 + $0x1c4] ss:$16 sps:$4 sm:$0xff]  }
  0x25   : > { %1959 = vmatpush3.bf16.msra.mxu0 %v2222_v30  ;;  %v2310_v25 = vld [vmem:[%s2481_s12 + $0x1cc] ss:$16 sps:$4 sm:$0xff]   ;;  %v2312_v26 = vld [vmem:[%s2481_s12 + $0x1c0] ss:$16 sps:$4 sm:$0xff]   ;;  %v2313_v27 = vld [vmem:[%s2481_s12 + $0x1c8] ss:$16 sps:$4 sm:$0xff]  }
  0x26   : > { %2071 = vmatpush3.bf16.msra.mxu1 %v2223_v31  ;;  %v2314_v28 = vld [vmem:[%s2481_s12 + $0x1e4] ss:$16 sps:$4 sm:$0xff]   ;;  %v2316_v29 = vld [vmem:[%s2481_s12 + $0x1ec] ss:$16 sps:$4 sm:$0xff]   ;;  %v2318_v30 = vld [vmem:[%s2481_s12 + $0x1e0] ss:$16 sps:$4 sm:$0xff]  }
  0x27   : > { %v2319_v31 = vld [vmem:[%s2481_s12 + $0x1e8] ss:$16 sps:$4 sm:$0xff]  }
  0x28   : > { %969 = vmatmul.mubr.bf16.vlgmr.msra.gmra.mrb[0].mxu0 %v2224_v32 }
  0x29   : > { %1130 = vmatmul.mubr.bf16.vlgmr.msra.gmra.mrb[0].mxu1 %v2227_v34  ;;  %976 = vmatprep.mubr.bf16.mxu0 %v2230_v36 }
  0x2a   : > { %1137 = vmatprep.mubr.bf16.mxu1 %v2232_v37 }
  0x30   : > { %977 = vmatmul.mubr.bf16.gmra.mrb[4].mxu0 %v2234_v38 }
  0x31   : > { %1138 = vmatmul.mubr.bf16.gmra.mrb[4].mxu1 %v2235_v39  ;;  %984 = vmatprep.mubr.bf16.mxu0 %v2236_v40 }
  0x32   : > { %1145 = vmatprep.mubr.bf16.mxu1 %v2238_v41  ;;  %v2556_v41 = vld [vmem:[%s2623_s2] ss:$0 sm:$0xff] }
  0x38   : > { %985 = vmatmul.mubr.bf16.gmra.mrb[8].mxu0 %v2240_v42 }
  0x39   : > { %1146 = vmatmul.mubr.bf16.gmra.mrb[8].mxu1 %v2241_v43  ;;  %992 = vmatprep.mubr.bf16.mxu0 %v2242_v44 }
  0x3a   : > { %1153 = vmatprep.mubr.bf16.mxu1 %v2244_v45 }
  0x40   : > { %993 = vmatmul.mubr.bf16.gmra.mrb[12].mxu0 %v2246_v46 }
  0x41   : > { %1154 = vmatmul.mubr.bf16.gmra.mrb[12].mxu1 %v2247_v47  ;;  %1000 = vmatprep.mubr.bf16.mxu0 %v2248_v48 }
  0x42   : > { %1161 = vmatprep.mubr.bf16.mxu1 %v2250_v49 }
  0x48   : > { %1001 = vmatmul.mubr.bf16.gmra.mrb[16].mxu0 %v2252_v50 }
  0x49   : > { %1162 = vmatmul.mubr.bf16.gmra.mrb[16].mxu1 %v2253_v51  ;;  %1008 = vmatprep.mubr.bf16.mxu0 %v2254_v52 }
  0x4a   : > { %1169 = vmatprep.mubr.bf16.mxu1 %v2256_v53 }
  0x50   : > { %1009 = vmatmul.mubr.bf16.gmra.mrb[20].mxu0 %v2258_v54 }
  0x51   : > { %1170 = vmatmul.mubr.bf16.gmra.mrb[20].mxu1 %v2259_v55  ;;  %1016 = vmatprep.mubr.bf16.mxu0 %v2260_v56 }
  0x52   : > { %1177 = vmatprep.mubr.bf16.mxu1 %v2262_v57 }
  0x58   : > { %1017 = vmatmul.mubr.bf16.gmra.mrb[24].mxu0 %v2264_v58 }
  0x59   : > { %1178 = vmatmul.mubr.bf16.gmra.mrb[24].mxu1 %v2265_v59  ;;  %1024 = vmatprep.mubr.bf16.mxu0 %v2266_v60 }
  0x5a   : > { %1185 = vmatprep.mubr.bf16.mxu1 %v2268_v61 }
  0x60   : > { %1025 = vmatmul.mubr.bf16.gmra.mrb[28].mxu0 %v2270_v62 }
  0x61   : > { %1186 = vmatmul.mubr.bf16.gmra.mrb[28].mxu1 %v2271_v63  ;;  %1032 = vmatprep.mubr.bf16.mxu0 %v2272_v0 }
  0x62   : > { %1193 = vmatprep.mubr.bf16.mxu1 %v2274_v1 }
  0x68   : > { %1033 = vmatmul.mubr.bf16.gmra.mrb[32].mxu0 %v2276_v2 }
  0x69   : > { %1194 = vmatmul.mubr.bf16.gmra.mrb[32].mxu1 %v2277_v3  ;;  %1040 = vmatprep.mubr.bf16.mxu0 %v2278_v4 }
  0x6a   : > { %1201 = vmatprep.mubr.bf16.mxu1 %v2280_v5 }
  0x70   : > { %1041 = vmatmul.mubr.bf16.gmra.mrb[36].mxu0 %v2282_v6 }
  0x71   : > { %1202 = vmatmul.mubr.bf16.gmra.mrb[36].mxu1 %v2283_v7  ;;  %1048 = vmatprep.mubr.bf16.mxu0 %v2284_v8 }
  0x72   : > { %1209 = vmatprep.mubr.bf16.mxu1 %v2286_v9 }
  0x78   : > { %1049 = vmatmul.mubr.bf16.gmra.mrb[40].mxu0 %v2288_v10 }
  0x79   : > { %1210 = vmatmul.mubr.bf16.gmra.mrb[40].mxu1 %v2289_v11  ;;  %1056 = vmatprep.mubr.bf16.mxu0 %v2290_v12 }
  0x7a   : > { %1217 = vmatprep.mubr.bf16.mxu1 %v2292_v13 }
  0x80   : > { %1057 = vmatmul.mubr.bf16.gmra.mrb[44].mxu0 %v2294_v14 }
  0x81   : > { %1218 = vmatmul.mubr.bf16.gmra.mrb[44].mxu1 %v2295_v15  ;;  %1064 = vmatprep.mubr.bf16.mxu0 %v2296_v16 }
  0x82   : > { %1225 = vmatprep.mubr.bf16.mxu1 %v2298_v17 }
  0x88   : > { %1065 = vmatmul.mubr.bf16.gmra.mrb[48].mxu0 %v2300_v18 }
  0x89   : > { %1226 = vmatmul.mubr.bf16.gmra.mrb[48].mxu1 %v2301_v19  ;;  %1072 = vmatprep.mubr.bf16.mxu0 %v2302_v20 }
  0x8a   : > { %1233 = vmatprep.mubr.bf16.mxu1 %v2304_v21 }
  0x90   : > { %1073 = vmatmul.mubr.bf16.gmra.mrb[52].mxu0 %v2306_v22 }
  0x91   : > { %1234 = vmatmul.mubr.bf16.gmra.mrb[52].mxu1 %v2307_v23  ;;  %1080 = vmatprep.mubr.bf16.mxu0 %v2308_v24 }
  0x92   : > { %1241 = vmatprep.mubr.bf16.mxu1 %v2310_v25 }
  0x98   : > { %1081 = vmatmul.mubr.bf16.gmra.mrb[56].mxu0 %v2312_v26 }
  0x99   : > { %1242 = vmatmul.mubr.bf16.gmra.mrb[56].mxu1 %v2313_v27  ;;  %1088 = vmatprep.mubr.bf16.mxu0 %v2314_v28 }
  0x9a   : > { %1249 = vmatprep.mubr.bf16.mxu1 %v2316_v29 }
  0xa0   : > { %1089 = vmatmul.mubr.bf16.gmra.mrb[60].mxu0 %v2318_v30 }
  0xa1   : > { %1250 = vmatmul.mubr.bf16.gmra.mrb[60].mxu1 %v2319_v31 }
  0xfb   : > { %v1960_v32 = vpop.f32.mrb[0].mxu0 }
  0xfc   : > { %v2072_v33 = vpop.f32.mrb[0].mxu1  ;;  %v1961_v34 = vpop.f32.mrb[1].mxu0 }
  0xfd   : > { %v1962_v35 = vadd.f32 %v1961_v34, %v1960_v32  ;;  %v2073_v36 = vpop.f32.mrb[1].mxu1  ;;  %v1963_v37 = vpop.f32.mrb[2].mxu0 }
  0xfe   : > { %v2074_v38 = vadd.f32 %v2073_v36, %v2072_v33  ;;  %v2075_v39 = vpop.f32.mrb[2].mxu1  ;;  %v1964_v40 = vpop.f32.mrb[3].mxu0 }
  0xff   : > { %v1965_v42 = vadd.f32 %v1964_v40, %v1963_v37  ;;  %v2076_v43 = vpop.f32.mrb[3].mxu1 }
 0x100   : > { %v1132_v44 = vadd.f32 %v2074_v38, %v1962_v35  ;;  %v2077_v45 = vadd.f32 %v2076_v43, %v2075_v39 }
 0x102   : > { %v1364_v46 = vadd.f32 %v2556_v41, %v1132_v44  ;;  %v1135_v47 = vadd.f32 %v2077_v45, %v1965_v42 }
 0x103   : > { %v1966_v48 = vpop.f32.mrb[4].mxu0 }
 0x104   : > { %v1365_v49 = vadd.f32 %v2556_v41, %v1135_v47  ;;  %v2078_v50 = vpop.f32.mrb[4].mxu1  ;;  %v1967_v51 = vpop.f32.mrb[5].mxu0  ;;  %v1396_v55 = vmax.f32 %v1364_v46, 0.0 }
 0x105   : > { %v1968_v52 = vadd.f32 %v1967_v51, %v1966_v48  ;;  %v2079_v53 = vpop.f32.mrb[5].mxu1  ;;  %v1969_v54 = vpop.f32.mrb[6].mxu0 }
 0x106   : > { %v1397_v56 = vmax.f32 %v1365_v49, 0.0  ;;  %v2080_v57 = vadd.f32 %v2079_v53, %v2078_v50  ;;  %v2081_v58 = vpop.f32.mrb[6].mxu1  ;;  %v1970_v59 = vpop.f32.mrb[7].mxu0 }
 0x107   : > { %v1971_v60 = vadd.f32 %v1970_v59, %v1969_v54  ;;  %v2082_v61 = vpop.f32.mrb[7].mxu1 }
 0x108   : > { %v1852_v62 = vpack.c.bf16 %v1397_v56, %v1396_v55  ;;  %v1140_v63 = vadd.f32 %v2080_v57, %v1968_v52  ;;  %v2083_v0 = vadd.f32 %v2082_v61, %v2081_v58 }
 0x10a   : > { %1853 = vst [vmem:[%s2564_s20] sm:$0xff] %v1852_v62   ;;  %v1366_v1 = vadd.f32 %v2556_v41, %v1140_v63  ;;  %v1143_v2 = vadd.f32 %v2083_v0, %v1971_v60 }
 0x10b   : > { %v1972_v3 = vpop.f32.mrb[8].mxu0 }
 0x10c   : > { %v1367_v4 = vadd.f32 %v2556_v41, %v1143_v2  ;;  %v2084_v5 = vpop.f32.mrb[8].mxu1  ;;  %v1973_v6 = vpop.f32.mrb[9].mxu0  ;;  %v1398_v10 = vmax.f32 %v1366_v1, 0.0 }
 0x10d   : > { %v1974_v7 = vadd.f32 %v1973_v6, %v1972_v3  ;;  %v2085_v8 = vpop.f32.mrb[9].mxu1  ;;  %v1975_v9 = vpop.f32.mrb[10].mxu0 }
 0x10e   : > { %v1399_v11 = vmax.f32 %v1367_v4, 0.0  ;;  %v2086_v12 = vadd.f32 %v2085_v8, %v2084_v5  ;;  %v2087_v13 = vpop.f32.mrb[10].mxu1  ;;  %v1976_v14 = vpop.f32.mrb[11].mxu0 }
 0x10f   : > { %v1977_v15 = vadd.f32 %v1976_v14, %v1975_v9  ;;  %v2088_v16 = vpop.f32.mrb[11].mxu1 }
 0x110   : > { %v1857_v17 = vpack.c.bf16 %v1399_v11, %v1398_v10  ;;  %v1148_v18 = vadd.f32 %v2086_v12, %v1974_v7  ;;  %v2089_v19 = vadd.f32 %v2088_v16, %v2087_v13 }
 0x112   : > { %1929 = vst [vmem:[%s2564_s20 + $0x8] sm:$0xff] %v1857_v17   ;;  %v1368_v20 = vadd.f32 %v2556_v41, %v1148_v18  ;;  %v1151_v21 = vadd.f32 %v2089_v19, %v1977_v15 }
 0x113   : > { %v1978_v22 = vpop.f32.mrb[12].mxu0 }
 0x114   : > { %v1369_v23 = vadd.f32 %v2556_v41, %v1151_v21  ;;  %v2090_v24 = vpop.f32.mrb[12].mxu1  ;;  %v1979_v25 = vpop.f32.mrb[13].mxu0  ;;  %v1400_v29 = vmax.f32 %v1368_v20, 0.0 }
 0x115   : > { %v1980_v26 = vadd.f32 %v1979_v25, %v1978_v22  ;;  %v2091_v27 = vpop.f32.mrb[13].mxu1  ;;  %v1981_v28 = vpop.f32.mrb[14].mxu0 }
 0x116   : > { %v1401_v30 = vmax.f32 %v1369_v23, 0.0  ;;  %v2092_v31 = vadd.f32 %v2091_v27, %v2090_v24  ;;  %v2093_v32 = vpop.f32.mrb[14].mxu1  ;;  %v1982_v33 = vpop.f32.mrb[15].mxu0 }
 0x117   : > { %v1983_v34 = vadd.f32 %v1982_v33, %v1981_v28  ;;  %v2094_v35 = vpop.f32.mrb[15].mxu1 }
 0x118   : > { %v1862_v36 = vpack.c.bf16 %v1401_v30, %v1400_v29  ;;  %v1156_v37 = vadd.f32 %v2092_v31, %v1980_v26  ;;  %v2095_v38 = vadd.f32 %v2094_v35, %v2093_v32 }
 0x11a   : > { %1930 = vst [vmem:[%s2564_s20 + $0x10] sm:$0xff] %v1862_v36   ;;  %v1370_v39 = vadd.f32 %v2556_v41, %v1156_v37  ;;  %v1159_v40 = vadd.f32 %v2095_v38, %v1983_v34 }
 0x11b   : > { %v1984_v42 = vpop.f32.mrb[16].mxu0 }
 0x11c   : > { %v1371_v43 = vadd.f32 %v2556_v41, %v1159_v40  ;;  %v2096_v44 = vpop.f32.mrb[16].mxu1  ;;  %v1985_v45 = vpop.f32.mrb[17].mxu0  ;;  %v1402_v49 = vmax.f32 %v1370_v39, 0.0 }
 0x11d   : > { %v1986_v46 = vadd.f32 %v1985_v45, %v1984_v42  ;;  %v2097_v47 = vpop.f32.mrb[17].mxu1  ;;  %v1987_v48 = vpop.f32.mrb[18].mxu0 }
 0x11e   : > { %v1403_v50 = vmax.f32 %v1371_v43, 0.0  ;;  %v2098_v51 = vadd.f32 %v2097_v47, %v2096_v44  ;;  %v2099_v52 = vpop.f32.mrb[18].mxu1  ;;  %v1988_v53 = vpop.f32.mrb[19].mxu0 }
 0x11f   : > { %v1989_v54 = vadd.f32 %v1988_v53, %v1987_v48  ;;  %v2100_v55 = vpop.f32.mrb[19].mxu1 }
 0x120   : > { %v1867_v56 = vpack.c.bf16 %v1403_v50, %v1402_v49  ;;  %v1164_v57 = vadd.f32 %v2098_v51, %v1986_v46  ;;  %v2101_v58 = vadd.f32 %v2100_v55, %v2099_v52 }
 0x122   : > { %1931 = vst [vmem:[%s2564_s20 + $0x18] sm:$0xff] %v1867_v56   ;;  %v1372_v59 = vadd.f32 %v2556_v41, %v1164_v57  ;;  %v1167_v60 = vadd.f32 %v2101_v58, %v1989_v54 }
 0x123   : > { %v1990_v61 = vpop.f32.mrb[20].mxu0 }
 0x124   : > { %v1373_v62 = vadd.f32 %v2556_v41, %v1167_v60  ;;  %v2102_v63 = vpop.f32.mrb[20].mxu1  ;;  %v1991_v0 = vpop.f32.mrb[21].mxu0  ;;  %v1404_v4 = vmax.f32 %v1372_v59, 0.0 }
 0x125   : > { %v1992_v1 = vadd.f32 %v1991_v0, %v1990_v61  ;;  %v2103_v2 = vpop.f32.mrb[21].mxu1  ;;  %v1993_v3 = vpop.f32.mrb[22].mxu0 }
 0x126   : > { %v1405_v5 = vmax.f32 %v1373_v62, 0.0  ;;  %v2104_v6 = vadd.f32 %v2103_v2, %v2102_v63  ;;  %v2105_v7 = vpop.f32.mrb[22].mxu1  ;;  %v1994_v8 = vpop.f32.mrb[23].mxu0 }
 0x127   : > { %v1995_v9 = vadd.f32 %v1994_v8, %v1993_v3  ;;  %v2106_v10 = vpop.f32.mrb[23].mxu1 }
 0x128   : > { %v1872_v11 = vpack.c.bf16 %v1405_v5, %v1404_v4  ;;  %v1172_v12 = vadd.f32 %v2104_v6, %v1992_v1  ;;  %v2107_v13 = vadd.f32 %v2106_v10, %v2105_v7 }
 0x12a   : > { %1932 = vst [vmem:[%s2564_s20 + $0x20] sm:$0xff] %v1872_v11   ;;  %v1374_v14 = vadd.f32 %v2556_v41, %v1172_v12  ;;  %v1175_v15 = vadd.f32 %v2107_v13, %v1995_v9 }
 0x12b   : > { %v1996_v16 = vpop.f32.mrb[24].mxu0 }
 0x12c   : > { %v1375_v17 = vadd.f32 %v2556_v41, %v1175_v15  ;;  %v2108_v18 = vpop.f32.mrb[24].mxu1  ;;  %v1997_v19 = vpop.f32.mrb[25].mxu0  ;;  %v1406_v23 = vmax.f32 %v1374_v14, 0.0 }
 0x12d   : > { %v1998_v20 = vadd.f32 %v1997_v19, %v1996_v16  ;;  %v2109_v21 = vpop.f32.mrb[25].mxu1  ;;  %v1999_v22 = vpop.f32.mrb[26].mxu0 }
 0x12e   : > { %v1407_v24 = vmax.f32 %v1375_v17, 0.0  ;;  %v2110_v25 = vadd.f32 %v2109_v21, %v2108_v18  ;;  %v2111_v26 = vpop.f32.mrb[26].mxu1  ;;  %v2000_v27 = vpop.f32.mrb[27].mxu0 }
 0x12f   : > { %v2001_v28 = vadd.f32 %v2000_v27, %v1999_v22  ;;  %v2112_v29 = vpop.f32.mrb[27].mxu1 }
 0x130   : > { %v1877_v30 = vpack.c.bf16 %v1407_v24, %v1406_v23  ;;  %v1180_v31 = vadd.f32 %v2110_v25, %v1998_v20  ;;  %v2113_v32 = vadd.f32 %v2112_v29, %v2111_v26 }
 0x132   : > { %1933 = vst [vmem:[%s2564_s20 + $0x28] sm:$0xff] %v1877_v30   ;;  %v1376_v33 = vadd.f32 %v2556_v41, %v1180_v31  ;;  %v1183_v34 = vadd.f32 %v2113_v32, %v2001_v28 }
 0x133   : > { %v2002_v35 = vpop.f32.mrb[28].mxu0 }
 0x134   : > { %v1377_v36 = vadd.f32 %v2556_v41, %v1183_v34  ;;  %v2114_v37 = vpop.f32.mrb[28].mxu1  ;;  %v2003_v38 = vpop.f32.mrb[29].mxu0  ;;  %v1408_v43 = vmax.f32 %v1376_v33, 0.0 }
 0x135   : > { %v2004_v39 = vadd.f32 %v2003_v38, %v2002_v35  ;;  %v2115_v40 = vpop.f32.mrb[29].mxu1  ;;  %v2005_v42 = vpop.f32.mrb[30].mxu0 }
 0x136   : > { %v1409_v44 = vmax.f32 %v1377_v36, 0.0  ;;  %v2116_v45 = vadd.f32 %v2115_v40, %v2114_v37  ;;  %v2117_v46 = vpop.f32.mrb[30].mxu1  ;;  %v2006_v47 = vpop.f32.mrb[31].mxu0 }
 0x137   : > { %v2007_v48 = vadd.f32 %v2006_v47, %v2005_v42  ;;  %v2118_v49 = vpop.f32.mrb[31].mxu1 }
 0x138   : > { %v1882_v50 = vpack.c.bf16 %v1409_v44, %v1408_v43  ;;  %v1188_v51 = vadd.f32 %v2116_v45, %v2004_v39  ;;  %v2119_v52 = vadd.f32 %v2118_v49, %v2117_v46 }
 0x13a   : > { %1934 = vst [vmem:[%s2564_s20 + $0x30] sm:$0xff] %v1882_v50   ;;  %v1378_v53 = vadd.f32 %v2556_v41, %v1188_v51  ;;  %v1191_v54 = vadd.f32 %v2119_v52, %v2007_v48 }
 0x13b   : > { %v2008_v55 = vpop.f32.mrb[32].mxu0 }
 0x13c   : > { %v1379_v56 = vadd.f32 %v2556_v41, %v1191_v54  ;;  %v2120_v57 = vpop.f32.mrb[32].mxu1  ;;  %v2009_v58 = vpop.f32.mrb[33].mxu0  ;;  %v1410_v62 = vmax.f32 %v1378_v53, 0.0 }
 0x13d   : > { %v2010_v59 = vadd.f32 %v2009_v58, %v2008_v55  ;;  %v2121_v60 = vpop.f32.mrb[33].mxu1  ;;  %v2011_v61 = vpop.f32.mrb[34].mxu0 }
 0x13e   : > { %v1411_v63 = vmax.f32 %v1379_v56, 0.0  ;;  %v2122_v0 = vadd.f32 %v2121_v60, %v2120_v57  ;;  %v2123_v1 = vpop.f32.mrb[34].mxu1  ;;  %v2012_v2 = vpop.f32.mrb[35].mxu0 }
 0x13f   : > { %v2013_v3 = vadd.f32 %v2012_v2, %v2011_v61  ;;  %v2124_v4 = vpop.f32.mrb[35].mxu1 }
 0x140   : > { %v1887_v5 = vpack.c.bf16 %v1411_v63, %v1410_v62  ;;  %v1196_v6 = vadd.f32 %v2122_v0, %v2010_v59  ;;  %v2125_v7 = vadd.f32 %v2124_v4, %v2123_v1 }
 0x142   : > { %1935 = vst [vmem:[%s2564_s20 + $0x38] sm:$0xff] %v1887_v5   ;;  %v1380_v8 = vadd.f32 %v2556_v41, %v1196_v6  ;;  %v1199_v9 = vadd.f32 %v2125_v7, %v2013_v3 }
 0x143   : > { %v2014_v10 = vpop.f32.mrb[36].mxu0 }
 0x144   : > { %v1381_v11 = vadd.f32 %v2556_v41, %v1199_v9  ;;  %v2126_v12 = vpop.f32.mrb[36].mxu1  ;;  %v2015_v13 = vpop.f32.mrb[37].mxu0  ;;  %v1412_v17 = vmax.f32 %v1380_v8, 0.0 }
 0x145   : > { %v2016_v14 = vadd.f32 %v2015_v13, %v2014_v10  ;;  %v2127_v15 = vpop.f32.mrb[37].mxu1  ;;  %v2017_v16 = vpop.f32.mrb[38].mxu0 }
 0x146   : > { %v1413_v18 = vmax.f32 %v1381_v11, 0.0  ;;  %v2128_v19 = vadd.f32 %v2127_v15, %v2126_v12  ;;  %v2129_v20 = vpop.f32.mrb[38].mxu1  ;;  %v2018_v21 = vpop.f32.mrb[39].mxu0 }
 0x147   : > { %v2019_v22 = vadd.f32 %v2018_v21, %v2017_v16  ;;  %v2130_v23 = vpop.f32.mrb[39].mxu1 }
 0x148   : > { %v1892_v24 = vpack.c.bf16 %v1413_v18, %v1412_v17  ;;  %v1204_v25 = vadd.f32 %v2128_v19, %v2016_v14  ;;  %v2131_v26 = vadd.f32 %v2130_v23, %v2129_v20 }
 0x14a   : > { %1936 = vst [vmem:[%s2564_s20 + $0x40] sm:$0xff] %v1892_v24   ;;  %v1382_v27 = vadd.f32 %v2556_v41, %v1204_v25  ;;  %v1207_v28 = vadd.f32 %v2131_v26, %v2019_v22 }
 0x14b   : > { %v2020_v29 = vpop.f32.mrb[40].mxu0 }
 0x14c   : > { %v1383_v30 = vadd.f32 %v2556_v41, %v1207_v28  ;;  %v2132_v31 = vpop.f32.mrb[40].mxu1  ;;  %v2021_v32 = vpop.f32.mrb[41].mxu0  ;;  %v1414_v36 = vmax.f32 %v1382_v27, 0.0 }
 0x14d   : > { %v2022_v33 = vadd.f32 %v2021_v32, %v2020_v29  ;;  %v2133_v34 = vpop.f32.mrb[41].mxu1  ;;  %v2023_v35 = vpop.f32.mrb[42].mxu0 }
 0x14e   : > { %v1415_v37 = vmax.f32 %v1383_v30, 0.0  ;;  %v2134_v38 = vadd.f32 %v2133_v34, %v2132_v31  ;;  %v2135_v39 = vpop.f32.mrb[42].mxu1  ;;  %v2024_v40 = vpop.f32.mrb[43].mxu0 }
 0x14f   : > { %v2025_v42 = vadd.f32 %v2024_v40, %v2023_v35  ;;  %v2136_v43 = vpop.f32.mrb[43].mxu1 }
 0x150   : > { %v1897_v44 = vpack.c.bf16 %v1415_v37, %v1414_v36  ;;  %v1212_v45 = vadd.f32 %v2134_v38, %v2022_v33  ;;  %v2137_v46 = vadd.f32 %v2136_v43, %v2135_v39 }
 0x152   : > { %1937 = vst [vmem:[%s2564_s20 + $0x48] sm:$0xff] %v1897_v44   ;;  %v1384_v47 = vadd.f32 %v2556_v41, %v1212_v45  ;;  %v1215_v48 = vadd.f32 %v2137_v46, %v2025_v42 }
 0x153   : > { %v2026_v49 = vpop.f32.mrb[44].mxu0 }
 0x154   : > { %v1385_v50 = vadd.f32 %v2556_v41, %v1215_v48  ;;  %v2138_v51 = vpop.f32.mrb[44].mxu1  ;;  %v2027_v52 = vpop.f32.mrb[45].mxu0  ;;  %v1416_v56 = vmax.f32 %v1384_v47, 0.0 }
 0x155   : > { %v2028_v53 = vadd.f32 %v2027_v52, %v2026_v49  ;;  %v2139_v54 = vpop.f32.mrb[45].mxu1  ;;  %v2029_v55 = vpop.f32.mrb[46].mxu0 }
 0x156   : > { %v1417_v57 = vmax.f32 %v1385_v50, 0.0  ;;  %v2140_v58 = vadd.f32 %v2139_v54, %v2138_v51  ;;  %v2141_v59 = vpop.f32.mrb[46].mxu1  ;;  %v2030_v60 = vpop.f32.mrb[47].mxu0 }
 0x157   : > { %v2031_v61 = vadd.f32 %v2030_v60, %v2029_v55  ;;  %v2142_v62 = vpop.f32.mrb[47].mxu1 }
 0x158   : > { %v1902_v63 = vpack.c.bf16 %v1417_v57, %v1416_v56  ;;  %v1220_v0 = vadd.f32 %v2140_v58, %v2028_v53  ;;  %v2143_v1 = vadd.f32 %v2142_v62, %v2141_v59 }
 0x15a   : > { %1938 = vst [vmem:[%s2564_s20 + $0x50] sm:$0xff] %v1902_v63   ;;  %v1386_v2 = vadd.f32 %v2556_v41, %v1220_v0  ;;  %v1223_v3 = vadd.f32 %v2143_v1, %v2031_v61 }
 0x15b   : > { %v2032_v4 = vpop.f32.mrb[48].mxu0 }
 0x15c   : > { %v1387_v5 = vadd.f32 %v2556_v41, %v1223_v3  ;;  %v2144_v6 = vpop.f32.mrb[48].mxu1  ;;  %v2033_v7 = vpop.f32.mrb[49].mxu0  ;;  %v1418_v11 = vmax.f32 %v1386_v2, 0.0 }
 0x15d   : > { %v2034_v8 = vadd.f32 %v2033_v7, %v2032_v4  ;;  %v2145_v9 = vpop.f32.mrb[49].mxu1  ;;  %v2035_v10 = vpop.f32.mrb[50].mxu0 }
 0x15e   : > { %v1419_v12 = vmax.f32 %v1387_v5, 0.0  ;;  %v2146_v13 = vadd.f32 %v2145_v9, %v2144_v6  ;;  %v2147_v14 = vpop.f32.mrb[50].mxu1  ;;  %v2036_v15 = vpop.f32.mrb[51].mxu0 }
 0x15f   : > { %v2037_v16 = vadd.f32 %v2036_v15, %v2035_v10  ;;  %v2148_v17 = vpop.f32.mrb[51].mxu1 }
 0x160   : > { %v1907_v18 = vpack.c.bf16 %v1419_v12, %v1418_v11  ;;  %v1228_v19 = vadd.f32 %v2146_v13, %v2034_v8  ;;  %v2149_v20 = vadd.f32 %v2148_v17, %v2147_v14 }
 0x162   : > { %1939 = vst [vmem:[%s2564_s20 + $0x58] sm:$0xff] %v1907_v18   ;;  %v1388_v21 = vadd.f32 %v2556_v41, %v1228_v19  ;;  %v1231_v22 = vadd.f32 %v2149_v20, %v2037_v16 }
 0x163   : > { %v2038_v23 = vpop.f32.mrb[52].mxu0 }
 0x164   : > { %v1389_v24 = vadd.f32 %v2556_v41, %v1231_v22  ;;  %v2150_v25 = vpop.f32.mrb[52].mxu1  ;;  %v2039_v26 = vpop.f32.mrb[53].mxu0  ;;  %v1420_v30 = vmax.f32 %v1388_v21, 0.0 }
 0x165   : > { %v2040_v27 = vadd.f32 %v2039_v26, %v2038_v23  ;;  %v2151_v28 = vpop.f32.mrb[53].mxu1  ;;  %v2041_v29 = vpop.f32.mrb[54].mxu0 }
 0x166   : > { %v1421_v31 = vmax.f32 %v1389_v24, 0.0  ;;  %v2152_v32 = vadd.f32 %v2151_v28, %v2150_v25  ;;  %v2153_v33 = vpop.f32.mrb[54].mxu1  ;;  %v2042_v34 = vpop.f32.mrb[55].mxu0 }
 0x167   : > { %v2043_v35 = vadd.f32 %v2042_v34, %v2041_v29  ;;  %v2154_v36 = vpop.f32.mrb[55].mxu1 }
 0x168   : > { %v1912_v37 = vpack.c.bf16 %v1421_v31, %v1420_v30  ;;  %v1236_v38 = vadd.f32 %v2152_v32, %v2040_v27  ;;  %v2155_v39 = vadd.f32 %v2154_v36, %v2153_v33 }
 0x16a   : > { %1940 = vst [vmem:[%s2564_s20 + $0x60] sm:$0xff] %v1912_v37   ;;  %v1390_v40 = vadd.f32 %v2556_v41, %v1236_v38  ;;  %v1239_v42 = vadd.f32 %v2155_v39, %v2043_v35 }
 0x16b   : > { %v2044_v43 = vpop.f32.mrb[56].mxu0 }
 0x16c   : > { %v1391_v44 = vadd.f32 %v2556_v41, %v1239_v42  ;;  %v2156_v45 = vpop.f32.mrb[56].mxu1  ;;  %v2045_v46 = vpop.f32.mrb[57].mxu0  ;;  %v1422_v50 = vmax.f32 %v1390_v40, 0.0 }
 0x16d   : > { %v2046_v47 = vadd.f32 %v2045_v46, %v2044_v43  ;;  %v2157_v48 = vpop.f32.mrb[57].mxu1  ;;  %v2047_v49 = vpop.f32.mrb[58].mxu0 }
 0x16e   : > { %v1423_v51 = vmax.f32 %v1391_v44, 0.0  ;;  %v2158_v52 = vadd.f32 %v2157_v48, %v2156_v45  ;;  %v2159_v53 = vpop.f32.mrb[58].mxu1  ;;  %v2048_v54 = vpop.f32.mrb[59].mxu0 }
 0x16f   : > { %v2049_v55 = vadd.f32 %v2048_v54, %v2047_v49  ;;  %v2160_v56 = vpop.f32.mrb[59].mxu1 }
 0x170   : > { %v1917_v57 = vpack.c.bf16 %v1423_v51, %v1422_v50  ;;  %v1244_v58 = vadd.f32 %v2158_v52, %v2046_v47  ;;  %v2161_v59 = vadd.f32 %v2160_v56, %v2159_v53 }
 0x172   : > { %1941 = vst [vmem:[%s2564_s20 + $0x68] sm:$0xff] %v1917_v57   ;;  %v1392_v60 = vadd.f32 %v2556_v41, %v1244_v58  ;;  %v1247_v61 = vadd.f32 %v2161_v59, %v2049_v55 }
 0x173   : > { %v2050_v62 = vpop.f32.mrb[60].mxu0 }
 0x174   : > { %v1393_v63 = vadd.f32 %v2556_v41, %v1247_v61  ;;  %v2162_v0 = vpop.f32.mrb[60].mxu1  ;;  %v2051_v1 = vpop.f32.mrb[61].mxu0  ;;  %v1424_v5 = vmax.f32 %v1392_v60, 0.0 }
 0x175   : > { %v2052_v2 = vadd.f32 %v2051_v1, %v2050_v62  ;;  %v2163_v3 = vpop.f32.mrb[61].mxu1  ;;  %v2053_v4 = vpop.f32.mrb[62].mxu0 }
 0x176   : > { %v1425_v6 = vmax.f32 %v1393_v63, 0.0  ;;  %v2164_v7 = vadd.f32 %v2163_v3, %v2162_v0  ;;  %v2165_v8 = vpop.f32.mrb[62].mxu1  ;;  %v2054_v9 = vpop.f32.mrb[63].mxu0 }
 0x177   : > { %v2055_v10 = vadd.f32 %v2054_v9, %v2053_v4  ;;  %v2166_v11 = vpop.f32.mrb[63].mxu1 }
 0x178   : > { %v1922_v12 = vpack.c.bf16 %v1425_v6, %v1424_v5  ;;  %v1252_v13 = vadd.f32 %v2164_v7, %v2052_v2  ;;  %v2167_v14 = vadd.f32 %v2166_v11, %v2165_v8 }
 0x17a   : > { %1942 = vst [vmem:[%s2564_s20 + $0x70] sm:$0xff] %v1922_v12   ;;  %v1394_v15 = vadd.f32 %v2556_v41, %v1252_v13  ;;  %v1255_v16 = vadd.f32 %v2167_v14, %v2055_v10 }
 0x17c   : > { %v1395_v17 = vadd.f32 %v2556_v41, %v1255_v16  ;;  %v1426_v18 = vmax.f32 %v1394_v15, 0.0 }
 0x17e   : > { %v1427_v19 = vmax.f32 %v1395_v17, 0.0 }
 0x180   : > { %v1927_v20 = vpack.c.bf16 %v1427_v19, %v1426_v18 }
 0x182   : > { %1943 = vst [vmem:[%s2564_s20 + $0x78] sm:$0xff] %v1927_v20  }
 0x183 PF: > { %s13_s14 = sadd.s32 1, %s2342_s14   ;;  %s2625_s12 = smov %s2338_s13 }
 0x184   : > { %p10_p5 = scmp.ge.s32.totalorder %s13_s14, 4   ;;  %s2626_s13 = smov %s2628_s15 }
 0x186   :  { %12 = sbr.rel (!%p10_p5) target bundleno = 2 (0x2), region = 73 }

</bundles_post_ra>
